<compile_context>
chip_gen: v7x
topology: tpu7x:2x2x1
jax: 0.10.0
libtpu: 0.0.40
codegen_flags: <defaults>
</compile_context>

<pallas_src>
import functools
import math

import jax
import jax.numpy as jnp
from jax import lax
from jax.experimental import pallas as pl
from jax.experimental.pallas import tpu as pltpu


# ----------------------------------------------------------------------------
# small helpers
# ----------------------------------------------------------------------------
def _round_up(x, m):
    return (x + m - 1) // m * m


def _pick_time_block(t, cap=32):
    """Largest divisor of t that is <= cap (steps per grid iteration)."""
    for d in range(min(t, cap), 0, -1):
        if t % d == 0:
            return d
    return 1


def _pick_tile_m(m, cap=512):
    """M-tile for the dense kernels: full M if small, else a multiple of 8."""
    if m <= cap:
        return m
    for d in range(cap - cap % 8, 7, -8):
        if m % d == 0:
            return d
    return m  # fallback: single block over M


# ----------------------------------------------------------------------------
# Pallas kernels
# ----------------------------------------------------------------------------
def dense_kernel(x_ref, w_ref, b_ref, o_ref):
    """(tm, K) @ (K, N) + (1, N); fp32 accumulate, operands cast to w dtype."""
    acc = jnp.dot(x_ref[...].astype(w_ref.dtype), w_ref[...],
                  preferred_element_type=jnp.float32)
    o_ref[...] = (acc + b_ref[...]).astype(o_ref.dtype)


def gru_recurrence_kernel(gi_ref, whh_ref, bhh_ref, out_ref, hfin_ref, h_scr,
                          *, tb, hp):
    """GRU recurrence over one time-block of `tb` steps.

    gi_ref   : (tb, Bp, 3*hp)  precomputed x@W_ih + b_ih for these steps (fp32)
    whh_ref  : (hp, 3*hp)      fused hidden weights [W_hr | W_hz | W_hn]^T
    bhh_ref  : (1, 3*hp)       fused hidden bias    [b_hr | b_hz | b_hn]
    out_ref  : (tb, Bp, hp)    per-step hidden outputs
    hfin_ref : (Bp, hp)        final hidden state (resident accumulator block)
    h_scr    : VMEM (Bp, hp) fp32 recurrent state carried across grid steps
    """
    tblk = pl.program_id(0)

    @pl.when(tblk == 0)
    def _():
        h_scr[...] = jnp.zeros_like(h_scr)
        hfin_ref[...] = jnp.zeros_like(hfin_ref)   # safe init (review note)

    whh = whh_ref[...]
    bhh = bhh_ref[...]

    def step(i, h):
        gi = gi_ref[i]                                       # (Bp, 3*hp) fp32
        gh = jnp.dot(h.astype(whh.dtype), whh,
                     preferred_element_type=jnp.float32) + bhh
        r = jax.nn.sigmoid(gi[:, :hp] + gh[:, :hp])
        z = jax.nn.sigmoid(gi[:, hp:2 * hp] + gh[:, hp:2 * hp])
        n = jnp.tanh(gi[:, 2 * hp:] + r * gh[:, 2 * hp:])
        h_new = (1.0 - z) * n + z * h
        out_ref[i] = h_new.astype(out_ref.dtype)
        return h_new

    h_last = lax.fori_loop(0, tb, step, h_scr[...], unroll=True)
    h_scr[...] = h_last

    @pl.when(tblk == pl.num_programs(0) - 1)
    def _():
        hfin_ref[...] = h_last.astype(hfin_ref.dtype)


# ----------------------------------------------------------------------------
# pallas_call wrappers
# ----------------------------------------------------------------------------
def dense(x2d, w, b, out_dtype=jnp.float32):
    """x2d: (M, K), w: (K, N), b: (1, N) -> (M, N). Tiled over M."""
    m, k = x2d.shape
    n = w.shape[1]
    tm = _pick_tile_m(m)
    return pl.pallas_call(
        dense_kernel,
        out_shape=jax.ShapeDtypeStruct((m, n), out_dtype),
        grid=(m // tm,),
        in_specs=[
            pl.BlockSpec((tm, k), lambda i: (i, 0)),
            pl.BlockSpec((k, n), lambda i: (0, 0)),
            pl.BlockSpec((1, n), lambda i: (0, 0)),
        ],
        out_specs=pl.BlockSpec((tm, n), lambda i: (i, 0)),
        compiler_params=pltpu.CompilerParams(
            dimension_semantics=("parallel",)),
    )(x2d, w, b)


def gru_recurrence(gi_tbh, whh, bhh):
    """Run the serial GRU recurrence given precomputed input projections."""
    t, bp, three_hp = gi_tbh.shape
    hp = whh.shape[0]
    tb = _pick_time_block(t)
    kernel = functools.partial(gru_recurrence_kernel, tb=tb, hp=hp)
    out_seq, h_fin = pl.pallas_call(
        kernel,
        out_shape=(jax.ShapeDtypeStruct((t, bp, hp), jnp.float32),
                   jax.ShapeDtypeStruct((bp, hp), jnp.float32)),
        grid=(t // tb,),
        in_specs=[
            pl.BlockSpec((tb, bp, three_hp), lambda i: (i, 0, 0)),  # gi block
            pl.BlockSpec((hp, three_hp), lambda i: (0, 0)),         # W_hh fused
            pl.BlockSpec((1, three_hp), lambda i: (0, 0)),          # b_hh fused
        ],
        out_specs=(
            pl.BlockSpec((tb, bp, hp), lambda i: (i, 0, 0)),        # per-step h
            pl.BlockSpec((bp, hp), lambda i: (0, 0)),               # final h
        ),
        scratch_shapes=[pltpu.VMEM((bp, hp), jnp.float32)],
        compiler_params=pltpu.CompilerParams(
            dimension_semantics=("arbitrary",)),                    # serial in t
    )(gi_tbh, whh, bhh)
    return out_seq, h_fin


# ----------------------------------------------------------------------------
# Parameter preparation (done once, outside the per-forward path)
# ----------------------------------------------------------------------------
def _pad_gates_last(w, h, h_pad):
    """Pad each of the 3 gate chunks along the last dim from h to h_pad."""
    if h_pad == h:
        return w
    parts = jnp.split(w, 3, axis=-1)
    pad = [(0, 0)] * (w.ndim - 1) + [(0, h_pad - h)]
    return jnp.concatenate([jnp.pad(p, pad) for p in parts], axis=-1)


def prepare_params(params, hidden_dim, matmul_dtype=jnp.float32, lane=128):
    """Fuse/transpose/pad PyTorch-layout GRU + Linear weights once."""
    h = hidden_dim
    h_pad = _round_up(h, lane)
    layers = []
    for li, (w_ih, w_hh, b_ih, b_hh) in enumerate(params["gru_layers"]):
        wih_t = _pad_gates_last(w_ih.T, h, h_pad)          # (D_in, 3*h_pad)
        if li > 0 and h_pad != h:                          # input is padded h
            wih_t = jnp.pad(wih_t, ((0, h_pad - h), (0, 0)))
        whh_t = _pad_gates_last(w_hh.T, h, h_pad)          # (h, 3*h_pad)
        if h_pad != h:
            whh_t = jnp.pad(whh_t, ((0, h_pad - h), (0, 0)))
        bi = _pad_gates_last(b_ih.reshape(1, 3 * h), h, h_pad)
        bh = _pad_gates_last(b_hh.reshape(1, 3 * h), h, h_pad)
        layers.append(dict(
            wih=wih_t.astype(matmul_dtype),
            whh=whh_t.astype(matmul_dtype),
            bi=bi.astype(jnp.float32),
            bh=bh.astype(jnp.float32),
        ))
    o = params["fc_w"].shape[0]
    o_pad = _round_up(o, lane)
    fc_wt = jnp.pad(params["fc_w"].T, ((0, h_pad - h), (0, o_pad - o)))
    fc_b = jnp.pad(params["fc_b"], (0, o_pad - o)).reshape(1, o_pad)
    return dict(layers=layers,
                fc_w=fc_wt.astype(matmul_dtype),
                fc_b=fc_b.astype(jnp.float32))


# ----------------------------------------------------------------------------
# Forward pass (equivalent of GRU.forward)
# ----------------------------------------------------------------------------
@functools.partial(jax.jit, static_argnames=("hidden_dim", "output_size"))
def gru_forward(x_btd, prep, *, hidden_dim, output_size):
    b, t, _ = x_btd.shape
    b_pad = _round_up(b, 8)                                 # sublane-dense batch
    x_tbd = jnp.transpose(x_btd, (1, 0, 2)).astype(jnp.float32)   # (T, B, D)
    if b_pad != b:
        x_tbd = jnp.pad(x_tbd, ((0, 0), (0, b_pad - b), (0, 0)))

    layer_in = x_tbd
    hiddens = []
    for layer in prep["layers"]:
        d_in = layer_in.shape[-1]
        three_hp = layer["wih"].shape[1]
        # hoisted input projection for the whole sequence (one big matmul)
        gi = dense(layer_in.reshape(t * b_pad, d_in), layer["wih"], layer["bi"])
        gi = gi.reshape(t, b_pad, three_hp)
        # serial recurrence: one fused h @ W_hh matmul per step
        layer_in, h_fin = gru_recurrence(gi, layer["whh"], layer["bh"])
        hiddens.append(h_fin)

    hidden = jnp.stack(hiddens, axis=0)[:, :b, :hidden_dim]  # (n_layers, B, H)

    hp = layer_in.shape[-1]
    o_pad = prep["fc_w"].shape[1]
    out2d = dense(layer_in.reshape(t * b_pad, hp), prep["fc_w"], prep["fc_b"])
    out = out2d.reshape(t, b_pad, o_pad)[:, :b, :output_size]
    out = jnp.transpose(out, (1, 0, 2))                      # (B, T, O)
    return out, hidden


# ----------------------------------------------------------------------------
# Deterministic parameter init (PyTorch-style uniform(-1/sqrt(H), 1/sqrt(H)))
# ----------------------------------------------------------------------------
def init_params(key, input_size, output_size, hidden_dim, n_layers):
    k = 1.0 / math.sqrt(hidden_dim)
    layers = []
    for l in range(n_layers):
        d_in = input_size if l == 0 else hidden_dim
        key, k0, k1, k2, k3 = jax.random.split(key, 5)
        w_ih = jax.random.uniform(k0, (3 * hidden_dim, d_in), jnp.float32, -k, k)
        w_hh = jax.random.uniform(k1, (3 * hidden_dim, hidden_dim), jnp.float32, -k, k)
        b_ih = jax.random.uniform(k2, (3 * hidden_dim,), jnp.float32, -k, k)
        b_hh = jax.random.uniform(k3, (3 * hidden_dim,), jnp.float32, -k, k)
        layers.append((w_ih, w_hh, b_ih, b_hh))
    key, kf1, kf2 = jax.random.split(key, 3)
    fc_w = jax.random.uniform(kf1, (output_size, hidden_dim), jnp.float32, -k, k)
    fc_b = jax.random.uniform(kf2, (output_size,), jnp.float32, -k, k)
    return {"gru_layers": layers, "fc_w": fc_w, "fc_b": fc_b}


# ----------------------------------------------------------------------------
# Pure-JAX reference (same math as torch.nn.GRU + Linear) for verification
# ----------------------------------------------------------------------------
def ref_forward(x_btd, params):
    x = jnp.transpose(x_btd, (1, 0, 2))                 # (T, B, D)
    hiddens = []
    for (w_ih, w_hh, b_ih, b_hh) in params["gru_layers"]:
        H = w_hh.shape[1]
        h = jnp.zeros((x.shape[1], H), jnp.float32)
        outs = []
        for t in range(x.shape[0]):
            gi = x[t] @ w_ih.T + b_ih
            gh = h @ w_hh.T + b_hh
            i_r, i_z, i_n = jnp.split(gi, 3, axis=-1)
            h_r, h_z, h_n = jnp.split(gh, 3, axis=-1)
            r = jax.nn.sigmoid(i_r + h_r)
            z = jax.nn.sigmoid(i_z + h_z)
            n = jnp.tanh(i_n + r * h_n)
            h = (1.0 - z) * n + z * h
            outs.append(h)
        x = jnp.stack(outs, axis=0)
        hiddens.append(h)
    hidden = jnp.stack(hiddens, axis=0)
    out = jnp.einsum("tbh,oh->tbo", x, params["fc_w"]) + params["fc_b"]
    return jnp.transpose(out, (1, 0, 2)), hidden


# ----------------------------------------------------------------------------
if __name__ == "__main__":
    batch, seq_len = 2, 8
    input_size, hidden_dim, output_size, n_layers = 16, 32, 8, 2

    key = jax.random.PRNGKey(0)
    key, kx = jax.random.split(key)
    x = jax.random.normal(kx, (batch, seq_len, input_size), jnp.float32)

    params = init_params(key, input_size, output_size, hidden_dim, n_layers)
    out_ref, hidden_ref = ref_forward(x, params)

    # fp32 path: exact same math as torch.nn.GRU + Linear
    prep32 = prepare_params(params, hidden_dim, matmul_dtype=jnp.float32)
    out, hidden = jax.block_until_ready(
        gru_forward(x, prep32, hidden_dim=hidden_dim, output_size=output_size))

    assert out.shape == (batch, seq_len, output_size)
    assert hidden.shape == (n_layers, batch, hidden_dim)
    assert jnp.allclose(out, out_ref, rtol=1e-4, atol=1e-5)
    assert jnp.allclose(hidden, hidden_ref, rtol=1e-4, atol=1e-5)

    # bf16-weight path (full MXU rate on v6e/v7x, halved weight VMEM/DMA);
    # fp32 accumulation + fp32 elementwise, so deviation is small.
    prep16 = prepare_params(params, hidden_dim, matmul_dtype=jnp.bfloat16)
    out16, hidden16 = jax.block_until_ready(
        gru_forward(x, prep16, hidden_dim=hidden_dim, output_size=output_size))
    assert float(jnp.max(jnp.abs(out16 - out_ref))) < 0.2

    print("KERNEL_OK")
</pallas_src>

<mosaic_0001>
module attributes {stable_mosaic.version = 11 : i64} {
  func.func @dense_kernel(%arg0: i32, %arg1: memref<64x16xf32, #tpu.memory_space<vmem>>, %arg2: memref<16x384xf32, #tpu.memory_space<vmem>>, %arg3: memref<1x384xf32, #tpu.memory_space<vmem>>, %arg4: memref<64x384xf32, #tpu.memory_space<vmem>>) attributes {dimension_semantics = [#tpu.dimension_semantics<parallel>], iteration_bounds = array<i64: 1>, scalar_prefetch = 0 : i64, scratch_operands = 0 : i64, tpu.core_type = #tpu.core_type<tc>, window_params = [{transform_indices = @transform_0, window_bounds = array<i64: 64, 16>}, {pipeline_mode = #tpu.pipeline_mode<synchronous>, transform_indices = @transform_1, window_bounds = array<i64: 16, 384>}, {pipeline_mode = #tpu.pipeline_mode<synchronous>, transform_indices = @transform_2, window_bounds = array<i64: 1, 384>}, {transform_indices = @transform_3, window_bounds = array<i64: 64, 384>}]} {
    %c0 = arith.constant 0 : index
    %c0_0 = arith.constant 0 : index
    %0 = vector.load %arg1[%c0, %c0_0] : memref<64x16xf32, #tpu.memory_space<vmem>>, vector<64x16xf32>
    %c0_1 = arith.constant 0 : index
    %c0_2 = arith.constant 0 : index
    %1 = vector.load %arg2[%c0_1, %c0_2] : memref<16x384xf32, #tpu.memory_space<vmem>>, vector<16x384xf32>
    %cst = arith.constant dense<0.000000e+00> : vector<64x384xf32>
    %2 = tpu.matmul %0, %1, %cst {dimension_numbers = #tpu.dot_dimension_numbers<[1], [0], [0], [1], [0, 0, 1, 1], [], []>} : vector<64x16xf32>, vector<16x384xf32>, vector<64x384xf32> -> vector<64x384xf32>
    %c0_3 = arith.constant 0 : index
    %c0_4 = arith.constant 0 : index
    %3 = vector.load %arg3[%c0_3, %c0_4] : memref<1x384xf32, #tpu.memory_space<vmem>>, vector<1x384xf32>
    %4 = vector.broadcast %3 : vector<1x384xf32> to vector<64x384xf32>
    %5 = arith.addf %2, %4 : vector<64x384xf32>
    %c0_5 = arith.constant 0 : index
    %c0_6 = arith.constant 0 : index
    %6 = vector.load %arg4[%c0_5, %c0_6] : memref<64x384xf32, #tpu.memory_space<vmem>>, vector<64x384xf32>
    tpu.vector_store %arg4[%c0_5, %c0_6], %5 {strides = array<i32>} : memref<64x384xf32, #tpu.memory_space<vmem>>, vector<64x384xf32>,
    return
  }
  func.func @transform_0(%arg0: i32) -> (i32, i32) {
    %c0_i32 = arith.constant 0 : i32
    %c0_i32_0 = arith.constant 0 : i32
    return %arg0, %c0_i32 : i32, i32
  }
  func.func @transform_1(%arg0: i32) -> (i32, i32) {
    %c0_i32 = arith.constant 0 : i32
    %c0_i32_0 = arith.constant 0 : i32
    %c0_i32_1 = arith.constant 0 : i32
    return %c0_i32, %c0_i32_0 : i32, i32
  }
  func.func @transform_2(%arg0: i32) -> (i32, i32) {
    %c0_i32 = arith.constant 0 : i32
    %c0_i32_0 = arith.constant 0 : i32
    %c0_i32_1 = arith.constant 0 : i32
    return %c0_i32, %c0_i32_0 : i32, i32
  }
  func.func @transform_3(%arg0: i32) -> (i32, i32) {
    %c0_i32 = arith.constant 0 : i32
    %c0_i32_0 = arith.constant 0 : i32
    return %arg0, %c0_i32 : i32, i32
  }
}

module attributes {stable_mosaic.version = 11 : i64} {
  func.func @gru_recurrence_kernel(%arg0: i32, %arg1: memref<8x8x384xf32, #tpu.memory_space<vmem>>, %arg2: memref<128x384xf32, #tpu.memory_space<vmem>>, %arg3: memref<1x384xf32, #tpu.memory_space<vmem>>, %arg4: memref<8x8x128xf32, #tpu.memory_space<vmem>>, %arg5: memref<8x128xf32, #tpu.memory_space<vmem>>, %arg6: memref<8x128xf32, #tpu.memory_space<vmem>>) attributes {dimension_semantics = [#tpu.dimension_semantics<arbitrary>], iteration_bounds = array<i64: 1>, scalar_prefetch = 0 : i64, scratch_operands = 1 : i64, tpu.core_type = #tpu.core_type<tc>, window_params = [{transform_indices = @transform_0, window_bounds = array<i64: 8, 8, 384>}, {pipeline_mode = #tpu.pipeline_mode<synchronous>, transform_indices = @transform_1, window_bounds = array<i64: 128, 384>}, {pipeline_mode = #tpu.pipeline_mode<synchronous>, transform_indices = @transform_2, window_bounds = array<i64: 1, 384>}, {transform_indices = @transform_3, window_bounds = array<i64: 8, 8, 128>}, {pipeline_mode = #tpu.pipeline_mode<synchronous>, transform_indices = @transform_4, window_bounds = array<i64: 8, 128>}]} {
    %c0_i32 = arith.constant 0 : i32
    %0 = arith.cmpi eq, %arg0, %c0_i32 : i32
    %1 = arith.extui %0 : i1 to i32
    %c0_i32_0 = arith.constant 0 : i32
    %2 = arith.cmpi ne, %1, %c0_i32_0 : i32
    scf.if %2 {
      %cst_74 = arith.constant 0.000000e+00 : f32
      %298 = vector.broadcast %cst_74 : f32 to vector<8x128xf32>
      %c0_75 = arith.constant 0 : index
      %c0_76 = arith.constant 0 : index
      %299 = vector.load %arg6[%c0_75, %c0_76] : memref<8x128xf32, #tpu.memory_space<vmem>>, vector<8x128xf32>
      tpu.vector_store %arg6[%c0_75, %c0_76], %298 {strides = array<i32>} : memref<8x128xf32, #tpu.memory_space<vmem>>, vector<8x128xf32>,
      %cst_77 = arith.constant 0.000000e+00 : f32
      %300 = vector.broadcast %cst_77 : f32 to vector<8x128xf32>
      %c0_78 = arith.constant 0 : index
      %c0_79 = arith.constant 0 : index
      %301 = vector.load %arg5[%c0_78, %c0_79] : memref<8x128xf32, #tpu.memory_space<vmem>>, vector<8x128xf32>
      tpu.vector_store %arg5[%c0_78, %c0_79], %300 {strides = array<i32>} : memref<8x128xf32, #tpu.memory_space<vmem>>, vector<8x128xf32>,
    } else {
    }
    %c0 = arith.constant 0 : index
    %c0_1 = arith.constant 0 : index
    %3 = vector.load %arg2[%c0, %c0_1] : memref<128x384xf32, #tpu.memory_space<vmem>>, vector<128x384xf32>
    %c0_2 = arith.constant 0 : index
    %c0_3 = arith.constant 0 : index
    %4 = vector.load %arg3[%c0_2, %c0_3] : memref<1x384xf32, #tpu.memory_space<vmem>>, vector<1x384xf32>
    %c0_4 = arith.constant 0 : index
    %c0_5 = arith.constant 0 : index
    %5 = vector.load %arg6[%c0_4, %c0_5] : memref<8x128xf32, #tpu.memory_space<vmem>>, vector<8x128xf32>
    %c0_i32_6 = arith.constant 0 : i32
    %6 = arith.index_cast %c0_i32_6 : i32 to index
    %c0_7 = arith.constant 0 : index
    %c0_8 = arith.constant 0 : index
    %7 = vector.load %arg1[%6, %c0_7, %c0_8] : memref<8x8x384xf32, #tpu.memory_space<vmem>>, vector<1x8x384xf32>
    %8 = vector.shape_cast %7 : vector<1x8x384xf32> to vector<8x384xf32>
    %cst = arith.constant dense<0.000000e+00> : vector<8x384xf32>
    %9 = tpu.matmul %5, %3, %cst {dimension_numbers = #tpu.dot_dimension_numbers<[1], [0], [0], [1], [0, 0, 1, 1], [], []>} : vector<8x128xf32>, vector<128x384xf32>, vector<8x384xf32> -> vector<8x384xf32>
    %10 = vector.broadcast %4 : vector<1x384xf32> to vector<8x384xf32>
    %11 = arith.addf %9, %10 : vector<8x384xf32>
    %12 = vector.extract_strided_slice %8 {offsets = [0, 0], sizes = [8, 128], strides = [1, 1]} : vector<8x384xf32> to vector<8x128xf32>
    %13 = vector.extract_strided_slice %11 {offsets = [0, 0], sizes = [8, 128], strides = [1, 1]} : vector<8x384xf32> to vector<8x128xf32>
    %14 = arith.addf %12, %13 : vector<8x128xf32>
    %15 = arith.negf %14 : vector<8x128xf32>
    %16 = math.exp %15 : vector<8x128xf32>
    %cst_9 = arith.constant 1.000000e+00 : f32
    %17 = vector.broadcast %cst_9 : f32 to vector<8x128xf32>
    %18 = arith.addf %17, %16 : vector<8x128xf32>
    %19 = arith.divf %17, %18 : vector<8x128xf32>
    %20 = vector.extract_strided_slice %8 {offsets = [0, 128], sizes = [8, 128], strides = [1, 1]} : vector<8x384xf32> to vector<8x128xf32>
    %21 = vector.extract_strided_slice %11 {offsets = [0, 128], sizes = [8, 128], strides = [1, 1]} : vector<8x384xf32> to vector<8x128xf32>
    %22 = arith.addf %20, %21 : vector<8x128xf32>
    %23 = arith.negf %22 : vector<8x128xf32>
    %24 = math.exp %23 : vector<8x128xf32>
    %cst_10 = arith.constant 1.000000e+00 : f32
    %25 = vector.broadcast %cst_10 : f32 to vector<8x128xf32>
    %26 = arith.addf %25, %24 : vector<8x128xf32>
    %27 = arith.divf %25, %26 : vector<8x128xf32>
    %28 = vector.extract_strided_slice %8 {offsets = [0, 256], sizes = [8, 128], strides = [1, 1]} : vector<8x384xf32> to vector<8x128xf32>
    %29 = vector.extract_strided_slice %11 {offsets = [0, 256], sizes = [8, 128], strides = [1, 1]} : vector<8x384xf32> to vector<8x128xf32>
    %30 = arith.mulf %19, %29 : vector<8x128xf32>
    %31 = arith.addf %28, %30 : vector<8x128xf32>
    %32 = math.tanh %31 : vector<8x128xf32>
    %cst_11 = arith.constant 1.000000e+00 : f32
    %33 = vector.broadcast %cst_11 : f32 to vector<8x128xf32>
    %34 = arith.subf %33, %27 : vector<8x128xf32>
    %35 = arith.mulf %34, %32 : vector<8x128xf32>
    %36 = arith.mulf %27, %5 : vector<8x128xf32>
    %37 = arith.addf %35, %36 : vector<8x128xf32>
    %38 = arith.index_cast %c0_i32_6 : i32 to index
    %c0_12 = arith.constant 0 : index
    %c0_13 = arith.constant 0 : index
    %39 = vector.load %arg4[%38, %c0_12, %c0_13] : memref<8x8x128xf32, #tpu.memory_space<vmem>>, vector<1x8x128xf32>
    %40 = vector.shape_cast %39 : vector<1x8x128xf32> to vector<8x128xf32>
    %41 = vector.shape_cast %37 : vector<8x128xf32> to vector<1x8x128xf32>
    tpu.vector_store %arg4[%38, %c0_12, %c0_13], %41 {strides = array<i32>} : memref<8x8x128xf32, #tpu.memory_space<vmem>>, vector<1x8x128xf32>,
    %c1_i32 = arith.constant 1 : i32
    %42 = arith.index_cast %c1_i32 : i32 to index
    %c0_14 = arith.constant 0 : index
    %c0_15 = arith.constant 0 : index
    %43 = vector.load %arg1[%42, %c0_14, %c0_15] : memref<8x8x384xf32, #tpu.memory_space<vmem>>, vector<1x8x384xf32>
    %44 = vector.shape_cast %43 : vector<1x8x384xf32> to vector<8x384xf32>
    %cst_16 = arith.constant dense<0.000000e+00> : vector<8x384xf32>
    %45 = tpu.matmul %37, %3, %cst_16 {dimension_numbers = #tpu.dot_dimension_numbers<[1], [0], [0], [1], [0, 0, 1, 1], [], []>} : vector<8x128xf32>, vector<128x384xf32>, vector<8x384xf32> -> vector<8x384xf32>
    %46 = vector.broadcast %4 : vector<1x384xf32> to vector<8x384xf32>
    %47 = arith.addf %45, %46 : vector<8x384xf32>
    %48 = vector.extract_strided_slice %44 {offsets = [0, 0], sizes = [8, 128], strides = [1, 1]} : vector<8x384xf32> to vector<8x128xf32>
    %49 = vector.extract_strided_slice %47 {offsets = [0, 0], sizes = [8, 128], strides = [1, 1]} : vector<8x384xf32> to vector<8x128xf32>
    %50 = arith.addf %48, %49 : vector<8x128xf32>
    %51 = arith.negf %50 : vector<8x128xf32>
    %52 = math.exp %51 : vector<8x128xf32>
    %cst_17 = arith.constant 1.000000e+00 : f32
    %53 = vector.broadcast %cst_17 : f32 to vector<8x128xf32>
    %54 = arith.addf %53, %52 : vector<8x128xf32>
    %55 = arith.divf %53, %54 : vector<8x128xf32>
    %56 = vector.extract_strided_slice %44 {offsets = [0, 128], sizes = [8, 128], strides = [1, 1]} : vector<8x384xf32> to vector<8x128xf32>
    %57 = vector.extract_strided_slice %47 {offsets = [0, 128], sizes = [8, 128], strides = [1, 1]} : vector<8x384xf32> to vector<8x128xf32>
    %58 = arith.addf %56, %57 : vector<8x128xf32>
    %59 = arith.negf %58 : vector<8x128xf32>
    %60 = math.exp %59 : vector<8x128xf32>
    %cst_18 = arith.constant 1.000000e+00 : f32
    %61 = vector.broadcast %cst_18 : f32 to vector<8x128xf32>
    %62 = arith.addf %61, %60 : vector<8x128xf32>
    %63 = arith.divf %61, %62 : vector<8x128xf32>
    %64 = vector.extract_strided_slice %44 {offsets = [0, 256], sizes = [8, 128], strides = [1, 1]} : vector<8x384xf32> to vector<8x128xf32>
    %65 = vector.extract_strided_slice %47 {offsets = [0, 256], sizes = [8, 128], strides = [1, 1]} : vector<8x384xf32> to vector<8x128xf32>
    %66 = arith.mulf %55, %65 : vector<8x128xf32>
    %67 = arith.addf %64, %66 : vector<8x128xf32>
    %68 = math.tanh %67 : vector<8x128xf32>
    %cst_19 = arith.constant 1.000000e+00 : f32
    %69 = vector.broadcast %cst_19 : f32 to vector<8x128xf32>
    %70 = arith.subf %69, %63 : vector<8x128xf32>
    %71 = arith.mulf %70, %68 : vector<8x128xf32>
    %72 = arith.mulf %63, %37 : vector<8x128xf32>
    %73 = arith.addf %71, %72 : vector<8x128xf32>
    %74 = arith.index_cast %c1_i32 : i32 to index
    %c0_20 = arith.constant 0 : index
    %c0_21 = arith.constant 0 : index
    %75 = vector.load %arg4[%74, %c0_20, %c0_21] : memref<8x8x128xf32, #tpu.memory_space<vmem>>, vector<1x8x128xf32>
    %76 = vector.shape_cast %75 : vector<1x8x128xf32> to vector<8x128xf32>
    %77 = vector.shape_cast %73 : vector<8x128xf32> to vector<1x8x128xf32>
    tpu.vector_store %arg4[%74, %c0_20, %c0_21], %77 {strides = array<i32>} : memref<8x8x128xf32, #tpu.memory_space<vmem>>, vector<1x8x128xf32>,
    %c2_i32 = arith.constant 2 : i32
    %78 = arith.index_cast %c2_i32 : i32 to index
    %c0_22 = arith.constant 0 : index
    %c0_23 = arith.constant 0 : index
    %79 = vector.load %arg1[%78, %c0_22, %c0_23] : memref<8x8x384xf32, #tpu.memory_space<vmem>>, vector<1x8x384xf32>
    %80 = vector.shape_cast %79 : vector<1x8x384xf32> to vector<8x384xf32>
    %cst_24 = arith.constant dense<0.000000e+00> : vector<8x384xf32>
    %81 = tpu.matmul %73, %3, %cst_24 {dimension_numbers = #tpu.dot_dimension_numbers<[1], [0], [0], [1], [0, 0, 1, 1], [], []>} : vector<8x128xf32>, vector<128x384xf32>, vector<8x384xf32> -> vector<8x384xf32>
    %82 = vector.broadcast %4 : vector<1x384xf32> to vector<8x384xf32>
    %83 = arith.addf %81, %82 : vector<8x384xf32>
    %84 = vector.extract_strided_slice %80 {offsets = [0, 0], sizes = [8, 128], strides = [1, 1]} : vector<8x384xf32> to vector<8x128xf32>
    %85 = vector.extract_strided_slice %83 {offsets = [0, 0], sizes = [8, 128], strides = [1, 1]} : vector<8x384xf32> to vector<8x128xf32>
    %86 = arith.addf %84, %85 : vector<8x128xf32>
    %87 = arith.negf %86 : vector<8x128xf32>
    %88 = math.exp %87 : vector<8x128xf32>
    %cst_25 = arith.constant 1.000000e+00 : f32
    %89 = vector.broadcast %cst_25 : f32 to vector<8x128xf32>
    %90 = arith.addf %89, %88 : vector<8x128xf32>
    %91 = arith.divf %89, %90 : vector<8x128xf32>
    %92 = vector.extract_strided_slice %80 {offsets = [0, 128], sizes = [8, 128], strides = [1, 1]} : vector<8x384xf32> to vector<8x128xf32>
    %93 = vector.extract_strided_slice %83 {offsets = [0, 128], sizes = [8, 128], strides = [1, 1]} : vector<8x384xf32> to vector<8x128xf32>
    %94 = arith.addf %92, %93 : vector<8x128xf32>
    %95 = arith.negf %94 : vector<8x128xf32>
    %96 = math.exp %95 : vector<8x128xf32>
    %cst_26 = arith.constant 1.000000e+00 : f32
    %97 = vector.broadcast %cst_26 : f32 to vector<8x128xf32>
    %98 = arith.addf %97, %96 : vector<8x128xf32>
    %99 = arith.divf %97, %98 : vector<8x128xf32>
    %100 = vector.extract_strided_slice %80 {offsets = [0, 256], sizes = [8, 128], strides = [1, 1]} : vector<8x384xf32> to vector<8x128xf32>
    %101 = vector.extract_strided_slice %83 {offsets = [0, 256], sizes = [8, 128], strides = [1, 1]} : vector<8x384xf32> to vector<8x128xf32>
    %102 = arith.mulf %91, %101 : vector<8x128xf32>
    %103 = arith.addf %100, %102 : vector<8x128xf32>
    %104 = math.tanh %103 : vector<8x128xf32>
    %cst_27 = arith.constant 1.000000e+00 : f32
    %105 = vector.broadcast %cst_27 : f32 to vector<8x128xf32>
    %106 = arith.subf %105, %99 : vector<8x128xf32>
    %107 = arith.mulf %106, %104 : vector<8x128xf32>
    %108 = arith.mulf %99, %73 : vector<8x128xf32>
    %109 = arith.addf %107, %108 : vector<8x128xf32>
    %110 = arith.index_cast %c2_i32 : i32 to index
    %c0_28 = arith.constant 0 : index
    %c0_29 = arith.constant 0 : index
    %111 = vector.load %arg4[%110, %c0_28, %c0_29] : memref<8x8x128xf32, #tpu.memory_space<vmem>>, vector<1x8x128xf32>
    %112 = vector.shape_cast %111 : vector<1x8x128xf32> to vector<8x128xf32>
    %113 = vector.shape_cast %109 : vector<8x128xf32> to vector<1x8x128xf32>
    tpu.vector_store %arg4[%110, %c0_28, %c0_29], %113 {strides = array<i32>} : memref<8x8x128xf32, #tpu.memory_space<vmem>>, vector<1x8x128xf32>,
    %c3_i32 = arith.constant 3 : i32
    %114 = arith.index_cast %c3_i32 : i32 to index
    %c0_30 = arith.constant 0 : index
    %c0_31 = arith.constant 0 : index
    %115 = vector.load %arg1[%114, %c0_30, %c0_31] : memref<8x8x384xf32, #tpu.memory_space<vmem>>, vector<1x8x384xf32>
    %116 = vector.shape_cast %115 : vector<1x8x384xf32> to vector<8x384xf32>
    %cst_32 = arith.constant dense<0.000000e+00> : vector<8x384xf32>
    %117 = tpu.matmul %109, %3, %cst_32 {dimension_numbers = #tpu.dot_dimension_numbers<[1], [0], [0], [1], [0, 0, 1, 1], [], []>} : vector<8x128xf32>, vector<128x384xf32>, vector<8x384xf32> -> vector<8x384xf32>
    %118 = vector.broadcast %4 : vector<1x384xf32> to vector<8x384xf32>
    %119 = arith.addf %117, %118 : vector<8x384xf32>
    %120 = vector.extract_strided_slice %116 {offsets = [0, 0], sizes = [8, 128], strides = [1, 1]} : vector<8x384xf32> to vector<8x128xf32>
    %121 = vector.extract_strided_slice %119 {offsets = [0, 0], sizes = [8, 128], strides = [1, 1]} : vector<8x384xf32> to vector<8x128xf32>
    %122 = arith.addf %120, %121 : vector<8x128xf32>
    %123 = arith.negf %122 : vector<8x128xf32>
    %124 = math.exp %123 : vector<8x128xf32>
    %cst_33 = arith.constant 1.000000e+00 : f32
    %125 = vector.broadcast %cst_33 : f32 to vector<8x128xf32>
    %126 = arith.addf %125, %124 : vector<8x128xf32>
    %127 = arith.divf %125, %126 : vector<8x128xf32>
    %128 = vector.extract_strided_slice %116 {offsets = [0, 128], sizes = [8, 128], strides = [1, 1]} : vector<8x384xf32> to vector<8x128xf32>
    %129 = vector.extract_strided_slice %119 {offsets = [0, 128], sizes = [8, 128], strides = [1, 1]} : vector<8x384xf32> to vector<8x128xf32>
    %130 = arith.addf %128, %129 : vector<8x128xf32>
    %131 = arith.negf %130 : vector<8x128xf32>
    %132 = math.exp %131 : vector<8x128xf32>
    %cst_34 = arith.constant 1.000000e+00 : f32
    %133 = vector.broadcast %cst_34 : f32 to vector<8x128xf32>
    %134 = arith.addf %133, %132 : vector<8x128xf32>
    %135 = arith.divf %133, %134 : vector<8x128xf32>
    %136 = vector.extract_strided_slice %116 {offsets = [0, 256], sizes = [8, 128], strides = [1, 1]} : vector<8x384xf32> to vector<8x128xf32>
    %137 = vector.extract_strided_slice %119 {offsets = [0, 256], sizes = [8, 128], strides = [1, 1]} : vector<8x384xf32> to vector<8x128xf32>
    %138 = arith.mulf %127, %137 : vector<8x128xf32>
    %139 = arith.addf %136, %138 : vector<8x128xf32>
    %140 = math.tanh %139 : vector<8x128xf32>
    %cst_35 = arith.constant 1.000000e+00 : f32
    %141 = vector.broadcast %cst_35 : f32 to vector<8x128xf32>
    %142 = arith.subf %141, %135 : vector<8x128xf32>
    %143 = arith.mulf %142, %140 : vector<8x128xf32>
    %144 = arith.mulf %135, %109 : vector<8x128xf32>
    %145 = arith.addf %143, %144 : vector<8x128xf32>
    %146 = arith.index_cast %c3_i32 : i32 to index
    %c0_36 = arith.constant 0 : index
    %c0_37 = arith.constant 0 : index
    %147 = vector.load %arg4[%146, %c0_36, %c0_37] : memref<8x8x128xf32, #tpu.memory_space<vmem>>, vector<1x8x128xf32>
    %148 = vector.shape_cast %147 : vector<1x8x128xf32> to vector<8x128xf32>
    %149 = vector.shape_cast %145 : vector<8x128xf32> to vector<1x8x128xf32>
    tpu.vector_store %arg4[%146, %c0_36, %c0_37], %149 {strides = array<i32>} : memref<8x8x128xf32, #tpu.memory_space<vmem>>, vector<1x8x128xf32>,
    %c4_i32 = arith.constant 4 : i32
    %150 = arith.index_cast %c4_i32 : i32 to index
    %c0_38 = arith.constant 0 : index
    %c0_39 = arith.constant 0 : index
    %151 = vector.load %arg1[%150, %c0_38, %c0_39] : memref<8x8x384xf32, #tpu.memory_space<vmem>>, vector<1x8x384xf32>
    %152 = vector.shape_cast %151 : vector<1x8x384xf32> to vector<8x384xf32>
    %cst_40 = arith.constant dense<0.000000e+00> : vector<8x384xf32>
    %153 = tpu.matmul %145, %3, %cst_40 {dimension_numbers = #tpu.dot_dimension_numbers<[1], [0], [0], [1], [0, 0, 1, 1], [], []>} : vector<8x128xf32>, vector<128x384xf32>, vector<8x384xf32> -> vector<8x384xf32>
    %154 = vector.broadcast %4 : vector<1x384xf32> to vector<8x384xf32>
    %155 = arith.addf %153, %154 : vector<8x384xf32>
    %156 = vector.extract_strided_slice %152 {offsets = [0, 0], sizes = [8, 128], strides = [1, 1]} : vector<8x384xf32> to vector<8x128xf32>
    %157 = vector.extract_strided_slice %155 {offsets = [0, 0], sizes = [8, 128], strides = [1, 1]} : vector<8x384xf32> to vector<8x128xf32>
    %158 = arith.addf %156, %157 : vector<8x128xf32>
    %159 = arith.negf %158 : vector<8x128xf32>
    %160 = math.exp %159 : vector<8x128xf32>
    %cst_41 = arith.constant 1.000000e+00 : f32
    %161 = vector.broadcast %cst_41 : f32 to vector<8x128xf32>
    %162 = arith.addf %161, %160 : vector<8x128xf32>
    %163 = arith.divf %161, %162 : vector<8x128xf32>
    %164 = vector.extract_strided_slice %152 {offsets = [0, 128], sizes = [8, 128], strides = [1, 1]} : vector<8x384xf32> to vector<8x128xf32>
    %165 = vector.extract_strided_slice %155 {offsets = [0, 128], sizes = [8, 128], strides = [1, 1]} : vector<8x384xf32> to vector<8x128xf32>
    %166 = arith.addf %164, %165 : vector<8x128xf32>
    %167 = arith.negf %166 : vector<8x128xf32>
    %168 = math.exp %167 : vector<8x128xf32>
    %cst_42 = arith.constant 1.000000e+00 : f32
    %169 = vector.broadcast %cst_42 : f32 to vector<8x128xf32>
    %170 = arith.addf %169, %168 : vector<8x128xf32>
    %171 = arith.divf %169, %170 : vector<8x128xf32>
    %172 = vector.extract_strided_slice %152 {offsets = [0, 256], sizes = [8, 128], strides = [1, 1]} : vector<8x384xf32> to vector<8x128xf32>
    %173 = vector.extract_strided_slice %155 {offsets = [0, 256], sizes = [8, 128], strides = [1, 1]} : vector<8x384xf32> to vector<8x128xf32>
    %174 = arith.mulf %163, %173 : vector<8x128xf32>
    %175 = arith.addf %172, %174 : vector<8x128xf32>
    %176 = math.tanh %175 : vector<8x128xf32>
    %cst_43 = arith.constant 1.000000e+00 : f32
    %177 = vector.broadcast %cst_43 : f32 to vector<8x128xf32>
    %178 = arith.subf %177, %171 : vector<8x128xf32>
    %179 = arith.mulf %178, %176 : vector<8x128xf32>
    %180 = arith.mulf %171, %145 : vector<8x128xf32>
    %181 = arith.addf %179, %180 : vector<8x128xf32>
    %182 = arith.index_cast %c4_i32 : i32 to index
    %c0_44 = arith.constant 0 : index
    %c0_45 = arith.constant 0 : index
    %183 = vector.load %arg4[%182, %c0_44, %c0_45] : memref<8x8x128xf32, #tpu.memory_space<vmem>>, vector<1x8x128xf32>
    %184 = vector.shape_cast %183 : vector<1x8x128xf32> to vector<8x128xf32>
    %185 = vector.shape_cast %181 : vector<8x128xf32> to vector<1x8x128xf32>
    tpu.vector_store %arg4[%182, %c0_44, %c0_45], %185 {strides = array<i32>} : memref<8x8x128xf32, #tpu.memory_space<vmem>>, vector<1x8x128xf32>,
    %c5_i32 = arith.constant 5 : i32
    %186 = arith.index_cast %c5_i32 : i32 to index
    %c0_46 = arith.constant 0 : index
    %c0_47 = arith.constant 0 : index
    %187 = vector.load %arg1[%186, %c0_46, %c0_47] : memref<8x8x384xf32, #tpu.memory_space<vmem>>, vector<1x8x384xf32>
    %188 = vector.shape_cast %187 : vector<1x8x384xf32> to vector<8x384xf32>
    %cst_48 = arith.constant dense<0.000000e+00> : vector<8x384xf32>
    %189 = tpu.matmul %181, %3, %cst_48 {dimension_numbers = #tpu.dot_dimension_numbers<[1], [0], [0], [1], [0, 0, 1, 1], [], []>} : vector<8x128xf32>, vector<128x384xf32>, vector<8x384xf32> -> vector<8x384xf32>
    %190 = vector.broadcast %4 : vector<1x384xf32> to vector<8x384xf32>
    %191 = arith.addf %189, %190 : vector<8x384xf32>
    %192 = vector.extract_strided_slice %188 {offsets = [0, 0], sizes = [8, 128], strides = [1, 1]} : vector<8x384xf32> to vector<8x128xf32>
    %193 = vector.extract_strided_slice %191 {offsets = [0, 0], sizes = [8, 128], strides = [1, 1]} : vector<8x384xf32> to vector<8x128xf32>
    %194 = arith.addf %192, %193 : vector<8x128xf32>
    %195 = arith.negf %194 : vector<8x128xf32>
    %196 = math.exp %195 : vector<8x128xf32>
    %cst_49 = arith.constant 1.000000e+00 : f32
    %197 = vector.broadcast %cst_49 : f32 to vector<8x128xf32>
    %198 = arith.addf %197, %196 : vector<8x128xf32>
    %199 = arith.divf %197, %198 : vector<8x128xf32>
    %200 = vector.extract_strided_slice %188 {offsets = [0, 128], sizes = [8, 128], strides = [1, 1]} : vector<8x384xf32> to vector<8x128xf32>
    %201 = vector.extract_strided_slice %191 {offsets = [0, 128], sizes = [8, 128], strides = [1, 1]} : vector<8x384xf32> to vector<8x128xf32>
    %202 = arith.addf %200, %201 : vector<8x128xf32>
    %203 = arith.negf %202 : vector<8x128xf32>
    %204 = math.exp %203 : vector<8x128xf32>
    %cst_50 = arith.constant 1.000000e+00 : f32
    %205 = vector.broadcast %cst_50 : f32 to vector<8x128xf32>
    %206 = arith.addf %205, %204 : vector<8x128xf32>
    %207 = arith.divf %205, %206 : vector<8x128xf32>
    %208 = vector.extract_strided_slice %188 {offsets = [0, 256], sizes = [8, 128], strides = [1, 1]} : vector<8x384xf32> to vector<8x128xf32>
    %209 = vector.extract_strided_slice %191 {offsets = [0, 256], sizes = [8, 128], strides = [1, 1]} : vector<8x384xf32> to vector<8x128xf32>
    %210 = arith.mulf %199, %209 : vector<8x128xf32>
    %211 = arith.addf %208, %210 : vector<8x128xf32>
    %212 = math.tanh %211 : vector<8x128xf32>
    %cst_51 = arith.constant 1.000000e+00 : f32
    %213 = vector.broadcast %cst_51 : f32 to vector<8x128xf32>
    %214 = arith.subf %213, %207 : vector<8x128xf32>
    %215 = arith.mulf %214, %212 : vector<8x128xf32>
    %216 = arith.mulf %207, %181 : vector<8x128xf32>
    %217 = arith.addf %215, %216 : vector<8x128xf32>
    %218 = arith.index_cast %c5_i32 : i32 to index
    %c0_52 = arith.constant 0 : index
    %c0_53 = arith.constant 0 : index
    %219 = vector.load %arg4[%218, %c0_52, %c0_53] : memref<8x8x128xf32, #tpu.memory_space<vmem>>, vector<1x8x128xf32>
    %220 = vector.shape_cast %219 : vector<1x8x128xf32> to vector<8x128xf32>
    %221 = vector.shape_cast %217 : vector<8x128xf32> to vector<1x8x128xf32>
    tpu.vector_store %arg4[%218, %c0_52, %c0_53], %221 {strides = array<i32>} : memref<8x8x128xf32, #tpu.memory_space<vmem>>, vector<1x8x128xf32>,
    %c6_i32 = arith.constant 6 : i32
    %222 = arith.index_cast %c6_i32 : i32 to index
    %c0_54 = arith.constant 0 : index
    %c0_55 = arith.constant 0 : index
    %223 = vector.load %arg1[%222, %c0_54, %c0_55] : memref<8x8x384xf32, #tpu.memory_space<vmem>>, vector<1x8x384xf32>
    %224 = vector.shape_cast %223 : vector<1x8x384xf32> to vector<8x384xf32>
    %cst_56 = arith.constant dense<0.000000e+00> : vector<8x384xf32>
    %225 = tpu.matmul %217, %3, %cst_56 {dimension_numbers = #tpu.dot_dimension_numbers<[1], [0], [0], [1], [0, 0, 1, 1], [], []>} : vector<8x128xf32>, vector<128x384xf32>, vector<8x384xf32> -> vector<8x384xf32>
    %226 = vector.broadcast %4 : vector<1x384xf32> to vector<8x384xf32>
    %227 = arith.addf %225, %226 : vector<8x384xf32>
    %228 = vector.extract_strided_slice %224 {offsets = [0, 0], sizes = [8, 128], strides = [1, 1]} : vector<8x384xf32> to vector<8x128xf32>
    %229 = vector.extract_strided_slice %227 {offsets = [0, 0], sizes = [8, 128], strides = [1, 1]} : vector<8x384xf32> to vector<8x128xf32>
    %230 = arith.addf %228, %229 : vector<8x128xf32>
    %231 = arith.negf %230 : vector<8x128xf32>
    %232 = math.exp %231 : vector<8x128xf32>
    %cst_57 = arith.constant 1.000000e+00 : f32
    %233 = vector.broadcast %cst_57 : f32 to vector<8x128xf32>
    %234 = arith.addf %233, %232 : vector<8x128xf32>
    %235 = arith.divf %233, %234 : vector<8x128xf32>
    %236 = vector.extract_strided_slice %224 {offsets = [0, 128], sizes = [8, 128], strides = [1, 1]} : vector<8x384xf32> to vector<8x128xf32>
    %237 = vector.extract_strided_slice %227 {offsets = [0, 128], sizes = [8, 128], strides = [1, 1]} : vector<8x384xf32> to vector<8x128xf32>
    %238 = arith.addf %236, %237 : vector<8x128xf32>
    %239 = arith.negf %238 : vector<8x128xf32>
    %240 = math.exp %239 : vector<8x128xf32>
    %cst_58 = arith.constant 1.000000e+00 : f32
    %241 = vector.broadcast %cst_58 : f32 to vector<8x128xf32>
    %242 = arith.addf %241, %240 : vector<8x128xf32>
    %243 = arith.divf %241, %242 : vector<8x128xf32>
    %244 = vector.extract_strided_slice %224 {offsets = [0, 256], sizes = [8, 128], strides = [1, 1]} : vector<8x384xf32> to vector<8x128xf32>
    %245 = vector.extract_strided_slice %227 {offsets = [0, 256], sizes = [8, 128], strides = [1, 1]} : vector<8x384xf32> to vector<8x128xf32>
    %246 = arith.mulf %235, %245 : vector<8x128xf32>
    %247 = arith.addf %244, %246 : vector<8x128xf32>
    %248 = math.tanh %247 : vector<8x128xf32>
    %cst_59 = arith.constant 1.000000e+00 : f32
    %249 = vector.broadcast %cst_59 : f32 to vector<8x128xf32>
    %250 = arith.subf %249, %243 : vector<8x128xf32>
    %251 = arith.mulf %250, %248 : vector<8x128xf32>
    %252 = arith.mulf %243, %217 : vector<8x128xf32>
    %253 = arith.addf %251, %252 : vector<8x128xf32>
    %254 = arith.index_cast %c6_i32 : i32 to index
    %c0_60 = arith.constant 0 : index
    %c0_61 = arith.constant 0 : index
    %255 = vector.load %arg4[%254, %c0_60, %c0_61] : memref<8x8x128xf32, #tpu.memory_space<vmem>>, vector<1x8x128xf32>
    %256 = vector.shape_cast %255 : vector<1x8x128xf32> to vector<8x128xf32>
    %257 = vector.shape_cast %253 : vector<8x128xf32> to vector<1x8x128xf32>
    tpu.vector_store %arg4[%254, %c0_60, %c0_61], %257 {strides = array<i32>} : memref<8x8x128xf32, #tpu.memory_space<vmem>>, vector<1x8x128xf32>,
    %c7_i32 = arith.constant 7 : i32
    %258 = arith.index_cast %c7_i32 : i32 to index
    %c0_62 = arith.constant 0 : index
    %c0_63 = arith.constant 0 : index
    %259 = vector.load %arg1[%258, %c0_62, %c0_63] : memref<8x8x384xf32, #tpu.memory_space<vmem>>, vector<1x8x384xf32>
    %260 = vector.shape_cast %259 : vector<1x8x384xf32> to vector<8x384xf32>
    %cst_64 = arith.constant dense<0.000000e+00> : vector<8x384xf32>
    %261 = tpu.matmul %253, %3, %cst_64 {dimension_numbers = #tpu.dot_dimension_numbers<[1], [0], [0], [1], [0, 0, 1, 1], [], []>} : vector<8x128xf32>, vector<128x384xf32>, vector<8x384xf32> -> vector<8x384xf32>
    %262 = vector.broadcast %4 : vector<1x384xf32> to vector<8x384xf32>
    %263 = arith.addf %261, %262 : vector<8x384xf32>
    %264 = vector.extract_strided_slice %260 {offsets = [0, 0], sizes = [8, 128], strides = [1, 1]} : vector<8x384xf32> to vector<8x128xf32>
    %265 = vector.extract_strided_slice %263 {offsets = [0, 0], sizes = [8, 128], strides = [1, 1]} : vector<8x384xf32> to vector<8x128xf32>
    %266 = arith.addf %264, %265 : vector<8x128xf32>
    %267 = arith.negf %266 : vector<8x128xf32>
    %268 = math.exp %267 : vector<8x128xf32>
    %cst_65 = arith.constant 1.000000e+00 : f32
    %269 = vector.broadcast %cst_65 : f32 to vector<8x128xf32>
    %270 = arith.addf %269, %268 : vector<8x128xf32>
    %271 = arith.divf %269, %270 : vector<8x128xf32>
    %272 = vector.extract_strided_slice %260 {offsets = [0, 128], sizes = [8, 128], strides = [1, 1]} : vector<8x384xf32> to vector<8x128xf32>
    %273 = vector.extract_strided_slice %263 {offsets = [0, 128], sizes = [8, 128], strides = [1, 1]} : vector<8x384xf32> to vector<8x128xf32>
    %274 = arith.addf %272, %273 : vector<8x128xf32>
    %275 = arith.negf %274 : vector<8x128xf32>
    %276 = math.exp %275 : vector<8x128xf32>
    %cst_66 = arith.constant 1.000000e+00 : f32
    %277 = vector.broadcast %cst_66 : f32 to vector<8x128xf32>
    %278 = arith.addf %277, %276 : vector<8x128xf32>
    %279 = arith.divf %277, %278 : vector<8x128xf32>
    %280 = vector.extract_strided_slice %260 {offsets = [0, 256], sizes = [8, 128], strides = [1, 1]} : vector<8x384xf32> to vector<8x128xf32>
    %281 = vector.extract_strided_slice %263 {offsets = [0, 256], sizes = [8, 128], strides = [1, 1]} : vector<8x384xf32> to vector<8x128xf32>
    %282 = arith.mulf %271, %281 : vector<8x128xf32>
    %283 = arith.addf %280, %282 : vector<8x128xf32>
    %284 = math.tanh %283 : vector<8x128xf32>
    %cst_67 = arith.constant 1.000000e+00 : f32
    %285 = vector.broadcast %cst_67 : f32 to vector<8x128xf32>
    %286 = arith.subf %285, %279 : vector<8x128xf32>
    %287 = arith.mulf %286, %284 : vector<8x128xf32>
    %288 = arith.mulf %279, %253 : vector<8x128xf32>
    %289 = arith.addf %287, %288 : vector<8x128xf32>
    %290 = arith.index_cast %c7_i32 : i32 to index
    %c0_68 = arith.constant 0 : index
    %c0_69 = arith.constant 0 : index
    %291 = vector.load %arg4[%290, %c0_68, %c0_69] : memref<8x8x128xf32, #tpu.memory_space<vmem>>, vector<1x8x128xf32>
    %292 = vector.shape_cast %291 : vector<1x8x128xf32> to vector<8x128xf32>
    %293 = vector.shape_cast %289 : vector<8x128xf32> to vector<1x8x128xf32>
    tpu.vector_store %arg4[%290, %c0_68, %c0_69], %293 {strides = array<i32>} : memref<8x8x128xf32, #tpu.memory_space<vmem>>, vector<1x8x128xf32>,
    %c8_i32 = arith.constant 8 : i32
    %c0_70 = arith.constant 0 : index
    %c0_71 = arith.constant 0 : index
    %294 = vector.load %arg6[%c0_70, %c0_71] : memref<8x128xf32, #tpu.memory_space<vmem>>, vector<8x128xf32>
    tpu.vector_store %arg6[%c0_70, %c0_71], %289 {strides = array<i32>} : memref<8x128xf32, #tpu.memory_space<vmem>>, vector<8x128xf32>,
    %c0_i32_72 = arith.constant 0 : i32
    %295 = arith.cmpi eq, %arg0, %c0_i32_72 : i32
    %296 = arith.extui %295 : i1 to i32
    %c0_i32_73 = arith.constant 0 : i32
    %297 = arith.cmpi ne, %296, %c0_i32_73 : i32
    scf.if %297 {
      %c0_74 = arith.constant 0 : index
      %c0_75 = arith.constant 0 : index
      %298 = vector.load %arg5[%c0_74, %c0_75] : memref<8x128xf32, #tpu.memory_space<vmem>>, vector<8x128xf32>
      tpu.vector_store %arg5[%c0_74, %c0_75], %289 {strides = array<i32>} : memref<8x128xf32, #tpu.memory_space<vmem>>, vector<8x128xf32>,
    } else {
    }
    return
  }
  func.func @transform_0(%arg0: i32) -> (i32, i32, i32) {
    %c0_i32 = arith.constant 0 : i32
    %c0_i32_0 = arith.constant 0 : i32
    %c0_i32_1 = arith.constant 0 : i32
    return %arg0, %c0_i32, %c0_i32_0 : i32, i32, i32
  }
  func.func @transform_1(%arg0: i32) -> (i32, i32) {
    %c0_i32 = arith.constant 0 : i32
    %c0_i32_0 = arith.constant 0 : i32
    %c0_i32_1 = arith.constant 0 : i32
    return %c0_i32, %c0_i32_0 : i32, i32
  }
  func.func @transform_2(%arg0: i32) -> (i32, i32) {
    %c0_i32 = arith.constant 0 : i32
    %c0_i32_0 = arith.constant 0 : i32
    %c0_i32_1 = arith.constant 0 : i32
    return %c0_i32, %c0_i32_0 : i32, i32
  }
  func.func @transform_3(%arg0: i32) -> (i32, i32, i32) {
    %c0_i32 = arith.constant 0 : i32
    %c0_i32_0 = arith.constant 0 : i32
    %c0_i32_1 = arith.constant 0 : i32
    return %arg0, %c0_i32, %c0_i32_0 : i32, i32, i32
  }
  func.func @transform_4(%arg0: i32) -> (i32, i32) {
    %c0_i32 = arith.constant 0 : i32
    %c0_i32_0 = arith.constant 0 : i32
    %c0_i32_1 = arith.constant 0 : i32
    return %c0_i32, %c0_i32_0 : i32, i32
  }
}

module attributes {stable_mosaic.version = 11 : i64} {
  func.func @dense_kernel(%arg0: i32, %arg1: memref<64x128xf32, #tpu.memory_space<vmem>>, %arg2: memref<128x384xf32, #tpu.memory_space<vmem>>, %arg3: memref<1x384xf32, #tpu.memory_space<vmem>>, %arg4: memref<64x384xf32, #tpu.memory_space<vmem>>) attributes {dimension_semantics = [#tpu.dimension_semantics<parallel>], iteration_bounds = array<i64: 1>, scalar_prefetch = 0 : i64, scratch_operands = 0 : i64, tpu.core_type = #tpu.core_type<tc>, window_params = [{transform_indices = @transform_0, window_bounds = array<i64: 64, 128>}, {pipeline_mode = #tpu.pipeline_mode<synchronous>, transform_indices = @transform_1, window_bounds = array<i64: 128, 384>}, {pipeline_mode = #tpu.pipeline_mode<synchronous>, transform_indices = @transform_2, window_bounds = array<i64: 1, 384>}, {transform_indices = @transform_3, window_bounds = array<i64: 64, 384>}]} {
    %c0 = arith.constant 0 : index
    %c0_0 = arith.constant 0 : index
    %0 = vector.load %arg1[%c0, %c0_0] : memref<64x128xf32, #tpu.memory_space<vmem>>, vector<64x128xf32>
    %c0_1 = arith.constant 0 : index
    %c0_2 = arith.constant 0 : index
    %1 = vector.load %arg2[%c0_1, %c0_2] : memref<128x384xf32, #tpu.memory_space<vmem>>, vector<128x384xf32>
    %cst = arith.constant dense<0.000000e+00> : vector<64x384xf32>
    %2 = tpu.matmul %0, %1, %cst {dimension_numbers = #tpu.dot_dimension_numbers<[1], [0], [0], [1], [0, 0, 1, 1], [], []>} : vector<64x128xf32>, vector<128x384xf32>, vector<64x384xf32> -> vector<64x384xf32>
    %c0_3 = arith.constant 0 : index
    %c0_4 = arith.constant 0 : index
    %3 = vector.load %arg3[%c0_3, %c0_4] : memref<1x384xf32, #tpu.memory_space<vmem>>, vector<1x384xf32>
    %4 = vector.broadcast %3 : vector<1x384xf32> to vector<64x384xf32>
    %5 = arith.addf %2, %4 : vector<64x384xf32>
    %c0_5 = arith.constant 0 : index
    %c0_6 = arith.constant 0 : index
    %6 = vector.load %arg4[%c0_5, %c0_6] : memref<64x384xf32, #tpu.memory_space<vmem>>, vector<64x384xf32>
    tpu.vector_store %arg4[%c0_5, %c0_6], %5 {strides = array<i32>} : memref<64x384xf32, #tpu.memory_space<vmem>>, vector<64x384xf32>,
    return
  }
  func.func @transform_0(%arg0: i32) -> (i32, i32) {
    %c0_i32 = arith.constant 0 : i32
    %c0_i32_0 = arith.constant 0 : i32
    return %arg0, %c0_i32 : i32, i32
  }
  func.func @transform_1(%arg0: i32) -> (i32, i32) {
    %c0_i32 = arith.constant 0 : i32
    %c0_i32_0 = arith.constant 0 : i32
    %c0_i32_1 = arith.constant 0 : i32
    return %c0_i32, %c0_i32_0 : i32, i32
  }
  func.func @transform_2(%arg0: i32) -> (i32, i32) {
    %c0_i32 = arith.constant 0 : i32
    %c0_i32_0 = arith.constant 0 : i32
    %c0_i32_1 = arith.constant 0 : i32
    return %c0_i32, %c0_i32_0 : i32, i32
  }
  func.func @transform_3(%arg0: i32) -> (i32, i32) {
    %c0_i32 = arith.constant 0 : i32
    %c0_i32_0 = arith.constant 0 : i32
    return %arg0, %c0_i32 : i32, i32
  }
}

module attributes {stable_mosaic.version = 11 : i64} {
  func.func @dense_kernel(%arg0: i32, %arg1: memref<64x128xf32, #tpu.memory_space<vmem>>, %arg2: memref<128x128xf32, #tpu.memory_space<vmem>>, %arg3: memref<1x128xf32, #tpu.memory_space<vmem>>, %arg4: memref<64x128xf32, #tpu.memory_space<vmem>>) attributes {dimension_semantics = [#tpu.dimension_semantics<parallel>], iteration_bounds = array<i64: 1>, scalar_prefetch = 0 : i64, scratch_operands = 0 : i64, tpu.core_type = #tpu.core_type<tc>, window_params = [{transform_indices = @transform_0, window_bounds = array<i64: 64, 128>}, {pipeline_mode = #tpu.pipeline_mode<synchronous>, transform_indices = @transform_1, window_bounds = array<i64: 128, 128>}, {pipeline_mode = #tpu.pipeline_mode<synchronous>, transform_indices = @transform_2, window_bounds = array<i64: 1, 128>}, {transform_indices = @transform_3, window_bounds = array<i64: 64, 128>}]} {
    %c0 = arith.constant 0 : index
    %c0_0 = arith.constant 0 : index
    %0 = vector.load %arg1[%c0, %c0_0] : memref<64x128xf32, #tpu.memory_space<vmem>>, vector<64x128xf32>
    %c0_1 = arith.constant 0 : index
    %c0_2 = arith.constant 0 : index
    %1 = vector.load %arg2[%c0_1, %c0_2] : memref<128x128xf32, #tpu.memory_space<vmem>>, vector<128x128xf32>
    %cst = arith.constant dense<0.000000e+00> : vector<64x128xf32>
    %2 = tpu.matmul %0, %1, %cst {dimension_numbers = #tpu.dot_dimension_numbers<[1], [0], [0], [1], [0, 0, 1, 1], [], []>} : vector<64x128xf32>, vector<128x128xf32>, vector<64x128xf32> -> vector<64x128xf32>
    %c0_3 = arith.constant 0 : index
    %c0_4 = arith.constant 0 : index
    %3 = vector.load %arg3[%c0_3, %c0_4] : memref<1x128xf32, #tpu.memory_space<vmem>>, vector<1x128xf32>
    %4 = vector.broadcast %3 : vector<1x128xf32> to vector<64x128xf32>
    %5 = arith.addf %2, %4 : vector<64x128xf32>
    %c0_5 = arith.constant 0 : index
    %c0_6 = arith.constant 0 : index
    %6 = vector.load %arg4[%c0_5, %c0_6] : memref<64x128xf32, #tpu.memory_space<vmem>>, vector<64x128xf32>
    tpu.vector_store %arg4[%c0_5, %c0_6], %5 {strides = array<i32>} : memref<64x128xf32, #tpu.memory_space<vmem>>, vector<64x128xf32>,
    return
  }
  func.func @transform_0(%arg0: i32) -> (i32, i32) {
    %c0_i32 = arith.constant 0 : i32
    %c0_i32_0 = arith.constant 0 : i32
    return %arg0, %c0_i32 : i32, i32
  }
  func.func @transform_1(%arg0: i32) -> (i32, i32) {
    %c0_i32 = arith.constant 0 : i32
    %c0_i32_0 = arith.constant 0 : i32
    %c0_i32_1 = arith.constant 0 : i32
    return %c0_i32, %c0_i32_0 : i32, i32
  }
  func.func @transform_2(%arg0: i32) -> (i32, i32) {
    %c0_i32 = arith.constant 0 : i32
    %c0_i32_0 = arith.constant 0 : i32
    %c0_i32_1 = arith.constant 0 : i32
    return %c0_i32, %c0_i32_0 : i32, i32
  }
  func.func @transform_3(%arg0: i32) -> (i32, i32) {
    %c0_i32 = arith.constant 0 : i32
    %c0_i32_0 = arith.constant 0 : i32
    return %arg0, %c0_i32 : i32, i32
  }
}

</mosaic_0001>

<bundles_post_ra>
// kernel: gru_forward.5
= control target key start
LH: loop header
LB: loop body
LE: loop exit
PB: predicated region body
PF: predicated region fallthrough
CT: control target
= control target key end

     0   :  { %8 = vsyncpa [#allocation3], 0  ;;  %s407_s12 = smov [#allocation2]   ;;  %s591_s0 = inlined_call_operand.vmem [shape: f32[64,16], index: 0, kind: input, shape index: {}]   ;;  %s592_s1 = inlined_call_operand.vmem [shape: f32[16,384], index: 1, kind: input, shape index: {}]   ;;  %s593_s2 = inlined_call_operand.hbm [shape: f32[1,384], index: 2, kind: input, shape index: {}]   ;;  %s594_s3 = inlined_call_operand.vmem [shape: f32[64,384], index: 3, kind: output, shape index: {}]  }
   0x1   :  { %s19_s13 = sshll.u32 %s407_s12, 4  ;;  %s383_s16 = scalar_lea.hbm %s593_s2, 48  ;;  %s20_s13 = int_to_ptr.vmem [resolvable:$true] %s19_s13 }
   0x2   :  { %p384_p0 = scmp.ne.s32.totalorder %s593_s2, %s383_s16  ;;  %p387_p1 = scmp.lt.u32.totalorder %s383_s16, %s593_s2 }
   0x4   :  { %p389_p2 = pnand %p387_p1, %p384_p0 }
   0x6   :  { %392 = shalt.err (!%p389_p2)
}
   0x7   :  { %s393_s21 = scalar_lea.vmem %s20_s13, 48  ;;  %s397_s22 = scalar_lea.vmem %s20_s13, 64 }
   0x8   :  { %p394_p3 = scmp.ne.s32.totalorder %s20_s13, %s393_s21  ;;  %p398_p4 = scmp.lt.s32.totalorder %s20_s13, %s20_s13 }
   0x9   :  { %p399_p5 = scmp.lt.s32.totalorder %s397_s22, %s393_s21 }
   0xb   :  { %p400_p6 = por %p399_p5, %p398_p4 }
   0xd   :  { %p401_p7 = pnand %p400_p6, %p394_p3 }
   0xf   :  { %404 = shalt.err (!%p401_p7)
}
  0x10   :  { %22 = dma.hbm_to_vmem [thread:$0]  %s593_s2, 48, %s20_s13, [#allocation3]  }
  0x11   :  { %405 = dma.done.wait [#allocation3], 48  }
  0x12   :  { %406 = vsyncadd [#allocation3], 4294967248  ;;  %v408_v0 = vmov 0.0   ;;  %v35_v1 = vld [vmem:[%s592_s1 + $0x8] sm:$0xff]  ;;  %v38_v2 = vld [vmem:[%s592_s1 + $0x20] sm:$0xff]  ;;  %vm57_vm0 = vcmask 130048   ;;  %v42_v18 = vlaneseq }
  0x13   :  { %146 = vmatprep.mubr.f32.mxu0 %v408_v0  ;;  %182 = vmatprep.mubr.f32.mxu1 %v408_v0  ;;  %v34_v3 = vld [vmem:[%s592_s1] sm:$0xff]  ;;  %v371_v4 = vpack.c.bf16 %v38_v2, %v35_v1  ;;  %v37_v5 = vld [vmem:[%s592_s1 + $0x18] sm:$0xff]  ;;  %v36_v7 = vld [vmem:[%s592_s1 + $0x10] sm:$0xff] }
  0x14   :  { %v373_v6 = vpack.c.bf16 %v37_v5, %v34_v3  ;;  %v39_v8 = vld [vmem:[%s592_s1 + $0x28] sm:$0xff]  ;;  %v26_v10 = vld [vmem:[%s591_s0] sm:$0xff]  ;;  %v32_v11 = vld [vmem:[%s591_s0 + $0x30] sm:$0xff]  ;;  %v43_v19 = vshrl.u32 %v42_v18, 7 }
  0x15   :  { %372 = vmatprep.subr.bf16.mxu0 %v371_v4  ;;  %379 = vmatprep.subr.bf16.mxu1 %v371_v4  ;;  %v375_v9 = vpack.c.bf16 %v39_v8, %v36_v7  ;;  %v27_v12 = vld [vmem:[%s591_s0 + $0x8] sm:$0xff]  ;;  %v33_v13 = vld [vmem:[%s591_s0 + $0x38] sm:$0xff]  ;;  %v28_v14 = vld [vmem:[%s591_s0 + $0x10] sm:$0xff] }
  0x16   :  { %374 = vmatpush1.bf16.msra.mxu0 %v373_v6  ;;  %380 = vmatpush1.bf16.msra.mxu1 %v373_v6  ;;  %v29_v15 = vld [vmem:[%s591_s0 + $0x18] sm:$0xff]  ;;  %v30_v16 = vld [vmem:[%s591_s0 + $0x20] sm:$0xff]  ;;  %v31_v17 = vld [vmem:[%s591_s0 + $0x28] sm:$0xff]  ;;  %v44_v20 = vsub.s32 0, %v43_v19  ;;  %v48_v22 = vsub.s32 1, %v43_v19  ;;  %v52_v31 = vsub.s32 2, %v43_v19 }
  0x17   :  { %376 = vmatprep.subr.bf16.mxu1 %v375_v9  ;;  %v40_v21 = vld [vmem:[#allocation2] sm:$0x7] }
  0x18   :  { %v499_v23 = vrot.slane %v40_v21, %v44_v20  ;;  %v501_v24 = vrot.slane %v40_v21, %v48_v22  ;;  %v53_v40 = vrot.slane %v40_v21, %v52_v31 }
  0x19   :  { %329 = vmatmul.mubr.msk.f32.vlgmr.msra.gmra.mrb[0].mxu0 %vm57_vm0, %v26_v10  ;;  %335 = vmatmul.mubr.msk.f32.vlgmr.msra.gmra.mrb[0].mxu1 %vm57_vm0, %v32_v11 }
  0x1a   :  { %378 = vmatpush3.bf16.msra.mxu1 %v375_v9  ;;  %152 = vmatprep.mubr.f32.mxu0 %v408_v0 }
  0x1b   :  { %188 = vmatprep.mubr.f32.mxu1 %v408_v0 }
  0x1d   :  { %330 = vmatmul.mubr.msk.f32.gmra.mrb[2].mxu0 %vm57_vm0, %v27_v12  ;;  %336 = vmatmul.mubr.msk.f32.gmra.mrb[2].mxu1 %vm57_vm0, %v33_v13 }
  0x1e   :  { %158 = vmatprep.mubr.f32.mxu0 %v408_v0  ;;  %359 = vmatprep.mubr.msk.f32.mxu1 %vm57_vm0, %v26_v10 }
  0x21   :  { %331 = vmatmul.mubr.msk.f32.gmra.mrb[4].mxu0 %vm57_vm0, %v28_v14  ;;  %360 = vmatmul.mubr.msk.f32.vlgmr.msra.gmra.mrb[4].mxu1 %vm57_vm0, %v27_v12 }
  0x22   :  { %164 = vmatprep.mubr.f32.mxu0 %v408_v0  ;;  %362 = vmatprep.mubr.msk.f32.mxu1 %vm57_vm0, %v28_v14 }
  0x25   :  { %332 = vmatmul.mubr.msk.f32.gmra.mrb[6].mxu0 %vm57_vm0, %v29_v15  ;;  %363 = vmatmul.mubr.msk.f32.gmra.mrb[6].mxu1 %vm57_vm0, %v29_v15 }
  0x26   :  { %170 = vmatprep.mubr.f32.mxu0 %v408_v0  ;;  %365 = vmatprep.mubr.msk.f32.mxu1 %vm57_vm0, %v30_v16 }
  0x29   :  { %333 = vmatmul.mubr.msk.f32.gmra.mrb[8].mxu0 %vm57_vm0, %v30_v16  ;;  %366 = vmatmul.mubr.msk.f32.gmra.mrb[8].mxu1 %vm57_vm0, %v31_v17 }
  0x2a   :  { %176 = vmatprep.mubr.f32.mxu0 %v408_v0  ;;  %368 = vmatprep.mubr.msk.f32.mxu1 %vm57_vm0, %v32_v11 }
  0x2d   :  { %334 = vmatmul.mubr.msk.f32.gmra.mrb[10].mxu0 %vm57_vm0, %v31_v17  ;;  %369 = vmatmul.mubr.msk.f32.gmra.mrb[10].mxu1 %vm57_vm0, %v33_v13 }
  0xec   :  { %v148_v25 = vpop.f32.mrb[0].mxu0  ;;  %v184_v26 = vpop.f32.mrb[0].mxu1 }
  0xed   :  { %v149_v27 = vadd.f32 %v148_v25, %v499_v23  ;;  %v185_v28 = vadd.f32 %v184_v26, %v499_v23  ;;  %v150_v29 = vpop.f32.mrb[1].mxu0  ;;  %v186_v30 = vpop.f32.mrb[1].mxu1 }
  0xee   :  { %v151_v32 = vadd.f32 %v150_v29, %v501_v24  ;;  %v187_v33 = vadd.f32 %v186_v30, %v501_v24 }
  0xef   :  { %300 = vst [vmem:[%s594_s3] sm:$0xff] %v149_v27  ;;  %318 = vst [vmem:[%s594_s3 + $0x90] sm:$0xff] %v185_v28 }
  0xf0   :  { %301 = vst [vmem:[%s594_s3 + $0x8] sm:$0xff] %v151_v32  ;;  %319 = vst [vmem:[%s594_s3 + $0x98] sm:$0xff] %v187_v33  ;;  %v154_v34 = vpop.f32.mrb[2].mxu0  ;;  %v190_v35 = vpop.f32.mrb[2].mxu1 }
  0xf1   :  { %v155_v36 = vadd.f32 %v154_v34, %v499_v23  ;;  %v191_v37 = vadd.f32 %v190_v35, %v499_v23  ;;  %v156_v38 = vpop.f32.mrb[3].mxu0  ;;  %v192_v39 = vpop.f32.mrb[3].mxu1 }
  0xf2   :  { %v157_v41 = vadd.f32 %v156_v38, %v501_v24  ;;  %v193_v42 = vadd.f32 %v192_v39, %v501_v24 }
  0xf3   :  { %303 = vst [vmem:[%s594_s3 + $0x18] sm:$0xff] %v155_v36  ;;  %321 = vst [vmem:[%s594_s3 + $0xa8] sm:$0xff] %v191_v37 }
  0xf4   :  { %304 = vst [vmem:[%s594_s3 + $0x20] sm:$0xff] %v157_v41  ;;  %322 = vst [vmem:[%s594_s3 + $0xb0] sm:$0xff] %v193_v42  ;;  %v160_v43 = vpop.f32.mrb[4].mxu0  ;;  %v361_v44 = vpop.f32.mrb[4].mxu1 }
  0xf5   :  { %v161_v45 = vadd.f32 %v160_v43, %v499_v23  ;;  %v267_v46 = vadd.f32 %v361_v44, %v53_v40  ;;  %v162_v47 = vpop.f32.mrb[5].mxu0  ;;  %v261_v48 = vpop.f32.mrb[5].mxu1 }
  0xf6   :  { %v163_v49 = vadd.f32 %v162_v47, %v501_v24  ;;  %v262_v50 = vadd.f32 %v261_v48, %v53_v40 }
  0xf7   :  { %306 = vst [vmem:[%s594_s3 + $0x30] sm:$0xff] %v161_v45  ;;  %305 = vst [vmem:[%s594_s3 + $0x28] sm:$0xff] %v267_v46 }
  0xf8   :  { %307 = vst [vmem:[%s594_s3 + $0x38] sm:$0xff] %v163_v49  ;;  %302 = vst [vmem:[%s594_s3 + $0x10] sm:$0xff] %v262_v50  ;;  %v166_v51 = vpop.f32.mrb[6].mxu0  ;;  %v364_v52 = vpop.f32.mrb[6].mxu1 }
  0xf9   :  { %v167_v53 = vadd.f32 %v166_v51, %v499_v23  ;;  %v277_v54 = vadd.f32 %v364_v52, %v53_v40  ;;  %v168_v55 = vpop.f32.mrb[7].mxu0  ;;  %v271_v56 = vpop.f32.mrb[7].mxu1 }
  0xfa   :  { %v169_v57 = vadd.f32 %v168_v55, %v501_v24  ;;  %v272_v58 = vadd.f32 %v271_v56, %v53_v40 }
  0xfb   :  { %309 = vst [vmem:[%s594_s3 + $0x48] sm:$0xff] %v167_v53  ;;  %311 = vst [vmem:[%s594_s3 + $0x58] sm:$0xff] %v277_v54 }
  0xfc   :  { %310 = vst [vmem:[%s594_s3 + $0x50] sm:$0xff] %v169_v57  ;;  %308 = vst [vmem:[%s594_s3 + $0x40] sm:$0xff] %v272_v58  ;;  %v172_v59 = vpop.f32.mrb[8].mxu0  ;;  %v367_v60 = vpop.f32.mrb[8].mxu1 }
  0xfd   :  { %v173_v61 = vadd.f32 %v172_v59, %v499_v23  ;;  %v287_v62 = vadd.f32 %v367_v60, %v53_v40  ;;  %v174_v63 = vpop.f32.mrb[9].mxu0  ;;  %v281_v0 = vpop.f32.mrb[9].mxu1 }
  0xfe   :  { %v175_v1 = vadd.f32 %v174_v63, %v501_v24  ;;  %v282_v2 = vadd.f32 %v281_v0, %v53_v40 }
  0xff   :  { %312 = vst [vmem:[%s594_s3 + $0x60] sm:$0xff] %v173_v61  ;;  %317 = vst [vmem:[%s594_s3 + $0x88] sm:$0xff] %v287_v62 }
 0x100   :  { %313 = vst [vmem:[%s594_s3 + $0x68] sm:$0xff] %v175_v1  ;;  %314 = vst [vmem:[%s594_s3 + $0x70] sm:$0xff] %v282_v2  ;;  %v178_v3 = vpop.f32.mrb[10].mxu0  ;;  %v370_v4 = vpop.f32.mrb[10].mxu1 }
 0x101   :  { %v179_v5 = vadd.f32 %v178_v3, %v499_v23  ;;  %v297_v6 = vadd.f32 %v370_v4, %v53_v40  ;;  %v180_v7 = vpop.f32.mrb[11].mxu0  ;;  %v291_v8 = vpop.f32.mrb[11].mxu1 }
 0x102   :  { %v181_v9 = vadd.f32 %v180_v7, %v501_v24  ;;  %v292_v10 = vadd.f32 %v291_v8, %v53_v40 }
 0x103   :  { %315 = vst [vmem:[%s594_s3 + $0x78] sm:$0xff] %v179_v5  ;;  %323 = vst [vmem:[%s594_s3 + $0xb8] sm:$0xff] %v297_v6 }
 0x104   :  { %316 = vst [vmem:[%s594_s3 + $0x80] sm:$0xff] %v181_v9  ;;  %320 = vst [vmem:[%s594_s3 + $0xa0] sm:$0xff] %v292_v10 }
 0x105   :  { %328 = vsyncpa [#allocation3], 1 }

// kernel: gru_forward.9
= control target key start
LH: loop header
LB: loop body
LE: loop exit
PB: predicated region body
PF: predicated region fallthrough
CT: control target
= control target key end

     0   :  { %s398_s1 = inlined_call_operand.vmem [shape: f32[128,128], index: 1, kind: input, shape index: {}]   ;;  %s399_s0 = inlined_call_operand.vmem [shape: f32[64,128], index: 0, kind: input, shape index: {}]   ;;  %s400_s2 = inlined_call_operand.vmem [shape: f32[1,128], index: 2, kind: input, shape index: {}]   ;;  %s401_s3 = inlined_call_operand.vmem [shape: f32[64,128], index: 3, kind: output, shape index: {}]  }
   0x1   :  { %v22_v0 = vld [vmem:[%s398_s1] sm:$0xff]  ;;  %v23_v1 = vld [vmem:[%s398_s1 + $0x8] sm:$0xff]  ;;  %v24_v2 = vld [vmem:[%s398_s1 + $0x10] sm:$0xff] }
   0x2   :  { %v231_v3 = vpack.c.bf16 %v23_v1, %v22_v0  ;;  %v25_v4 = vld [vmem:[%s398_s1 + $0x18] sm:$0xff]  ;;  %v26_v6 = vld [vmem:[%s398_s1 + $0x20] sm:$0xff]  ;;  %v27_v7 = vld [vmem:[%s398_s1 + $0x28] sm:$0xff] }
   0x3   :  { %v235_v5 = vpack.c.bf16 %v25_v4, %v24_v2  ;;  %v239_v8 = vpack.c.bf16 %v27_v7, %v26_v6  ;;  %v14_v9 = vld [vmem:[%s399_s0] sm:$0xff]  ;;  %v28_v11 = vld [vmem:[%s398_s1 + $0x30] sm:$0xff]  ;;  %v29_v12 = vld [vmem:[%s398_s1 + $0x38] sm:$0xff] }
   0x4   :  { %232 = vmatprep.subr.bf16.mxu0 %v231_v3  ;;  %263 = vmatprep.subr.bf16.mxu1 %v231_v3  ;;  %v18_v10 = vld [vmem:[%s399_s0 + $0x20] sm:$0xff]  ;;  %v243_v13 = vpack.c.bf16 %v29_v12, %v28_v11  ;;  %v31_v15 = vld [vmem:[%s398_s1 + $0x48] sm:$0xff]  ;;  %v32_v17 = vld [vmem:[%s398_s1 + $0x50] sm:$0xff] }
   0x5   :  { %234 = vmatpush3.bf16.msra.mxu0 %v231_v3  ;;  %271 = vmatpush3.bf16.msra.mxu1 %v231_v3  ;;  %v30_v14 = vld [vmem:[%s398_s1 + $0x40] sm:$0xff]  ;;  %v33_v18 = vld [vmem:[%s398_s1 + $0x58] sm:$0xff]  ;;  %v35_v21 = vld [vmem:[%s398_s1 + $0x68] sm:$0xff] }
   0x6   :  { %236 = vmatprep.subr.bf16.mxu0 %v235_v5  ;;  %264 = vmatprep.subr.bf16.mxu1 %v235_v5  ;;  %v247_v16 = vpack.c.bf16 %v31_v15, %v30_v14  ;;  %v251_v19 = vpack.c.bf16 %v33_v18, %v32_v17  ;;  %v34_v20 = vld [vmem:[%s398_s1 + $0x60] sm:$0xff]  ;;  %v36_v23 = vld [vmem:[%s398_s1 + $0x70] sm:$0xff]  ;;  %v37_v24 = vld [vmem:[%s398_s1 + $0x78] sm:$0xff] }
   0x7   :  { %219 = vmatprep.mubr.f32.mxu0 %v14_v9  ;;  %225 = vmatprep.mubr.f32.mxu1 %v18_v10  ;;  %v255_v22 = vpack.c.bf16 %v35_v21, %v34_v20  ;;  %v259_v25 = vpack.c.bf16 %v37_v24, %v36_v23  ;;  %v15_v26 = vld [vmem:[%s399_s0 + $0x8] sm:$0xff]  ;;  %v16_v28 = vld [vmem:[%s399_s0 + $0x10] sm:$0xff]  ;;  %v17_v30 = vld [vmem:[%s399_s0 + $0x18] sm:$0xff] }
   0x8   :  { %v19_v27 = vld [vmem:[%s399_s0 + $0x28] sm:$0xff]  ;;  %v20_v29 = vld [vmem:[%s399_s0 + $0x30] sm:$0xff]  ;;  %v21_v31 = vld [vmem:[%s399_s0 + $0x38] sm:$0xff] }
   0x9   :  { %238 = vmatpush3.bf16.msra.mxu0 %v235_v5  ;;  %272 = vmatpush3.bf16.msra.mxu1 %v235_v5  ;;  %v162_v32 = vld [vmem:[%s400_s2] ss:$0 sm:$0xff] }
   0xa   :  { %240 = vmatprep.subr.bf16.mxu0 %v239_v8  ;;  %265 = vmatprep.subr.bf16.mxu1 %v239_v8 }
   0xd   :  { %242 = vmatpush3.bf16.msra.mxu0 %v239_v8  ;;  %273 = vmatpush3.bf16.msra.mxu1 %v239_v8 }
   0xe   :  { %244 = vmatprep.subr.bf16.mxu0 %v243_v13  ;;  %266 = vmatprep.subr.bf16.mxu1 %v243_v13 }
  0x11   :  { %246 = vmatpush3.bf16.msra.mxu0 %v243_v13  ;;  %274 = vmatpush3.bf16.msra.mxu1 %v243_v13 }
  0x12   :  { %248 = vmatprep.subr.bf16.mxu0 %v247_v16  ;;  %267 = vmatprep.subr.bf16.mxu1 %v247_v16 }
  0x15   :  { %250 = vmatpush3.bf16.msra.mxu0 %v247_v16  ;;  %275 = vmatpush3.bf16.msra.mxu1 %v247_v16 }
  0x16   :  { %252 = vmatprep.subr.bf16.mxu0 %v251_v19  ;;  %268 = vmatprep.subr.bf16.mxu1 %v251_v19 }
  0x19   :  { %254 = vmatpush3.bf16.msra.mxu0 %v251_v19  ;;  %276 = vmatpush3.bf16.msra.mxu1 %v251_v19 }
  0x1a   :  { %256 = vmatprep.subr.bf16.mxu0 %v255_v22  ;;  %269 = vmatprep.subr.bf16.mxu1 %v255_v22 }
  0x1d   :  { %258 = vmatpush3.bf16.msra.mxu0 %v255_v22  ;;  %277 = vmatpush3.bf16.msra.mxu1 %v255_v22 }
  0x1e   :  { %260 = vmatprep.subr.bf16.mxu0 %v259_v25  ;;  %270 = vmatprep.subr.bf16.mxu1 %v259_v25 }
  0x21   :  { %262 = vmatpush3.bf16.msra.mxu0 %v259_v25  ;;  %278 = vmatpush3.bf16.msra.mxu1 %v259_v25 }
  0x24   :  { %220 = vmatmul.mubr.f32.vlgmr.msra.gmra.mrb[0].mxu0 %v15_v26  ;;  %226 = vmatmul.mubr.f32.vlgmr.msra.gmra.mrb[0].mxu1 %v19_v27 }
  0x25   :  { %222 = vmatprep.mubr.f32.mxu0 %v16_v28  ;;  %228 = vmatprep.mubr.f32.mxu1 %v20_v29 }
  0x28   :  { %223 = vmatmul.mubr.f32.gmra.mrb[2].mxu0 %v17_v30  ;;  %229 = vmatmul.mubr.f32.gmra.mrb[2].mxu1 %v21_v31 }
  0xf7   :  { %v221_v33 = vpop.f32.mrb[0].mxu0  ;;  %v227_v34 = vpop.f32.mrb[0].mxu1 }
  0xf8   :  { %v117_v35 = vadd.f32 %v221_v33, %v162_v32  ;;  %v137_v36 = vadd.f32 %v227_v34, %v162_v32  ;;  %v111_v37 = vpop.f32.mrb[1].mxu0  ;;  %v131_v38 = vpop.f32.mrb[1].mxu1 }
  0xf9   :  { %v112_v39 = vadd.f32 %v162_v32, %v111_v37  ;;  %v132_v40 = vadd.f32 %v162_v32, %v131_v38 }
  0xfa   :  { %151 = vst [vmem:[%s401_s3 + $0x8] sm:$0xff] %v117_v35  ;;  %155 = vst [vmem:[%s401_s3 + $0x28] sm:$0xff] %v137_v36 }
  0xfb   :  { %150 = vst [vmem:[%s401_s3] sm:$0xff] %v112_v39  ;;  %154 = vst [vmem:[%s401_s3 + $0x20] sm:$0xff] %v132_v40  ;;  %v224_v41 = vpop.f32.mrb[2].mxu0  ;;  %v230_v42 = vpop.f32.mrb[2].mxu1 }
  0xfc   :  { %v127_v43 = vadd.f32 %v224_v41, %v162_v32  ;;  %v147_v44 = vadd.f32 %v230_v42, %v162_v32  ;;  %v121_v45 = vpop.f32.mrb[3].mxu0  ;;  %v141_v46 = vpop.f32.mrb[3].mxu1 }
  0xfd   :  { %v122_v47 = vadd.f32 %v162_v32, %v121_v45  ;;  %v142_v48 = vadd.f32 %v162_v32, %v141_v46 }
  0xfe   :  { %153 = vst [vmem:[%s401_s3 + $0x18] sm:$0xff] %v127_v43  ;;  %157 = vst [vmem:[%s401_s3 + $0x38] sm:$0xff] %v147_v44 }
  0xff   :  { %152 = vst [vmem:[%s401_s3 + $0x10] sm:$0xff] %v122_v47  ;;  %156 = vst [vmem:[%s401_s3 + $0x30] sm:$0xff] %v142_v48 }

// kernel: gru_forward.7
= control target key start
LH: loop header
LB: loop body
LE: loop exit
PB: predicated region body
PF: predicated region fallthrough
CT: control target
= control target key end

     0   :  { %v466_v3 = vmov 0.0   ;;  %s758_s1 = inlined_call_operand.vmem [shape: f32[128,384], index: 1, kind: input, shape index: {}]   ;;  %s759_s0 = inlined_call_operand.vmem [shape: f32[64,128], index: 0, kind: input, shape index: {}]   ;;  %s760_s2 = inlined_call_operand.vmem [shape: f32[1,384], index: 2, kind: input, shape index: {}]   ;;  %s761_s3 = inlined_call_operand.vmem [shape: f32[64,384], index: 3, kind: output, shape index: {}]  }
   0x1   :  { %v23_v0 = vld [vmem:[%s758_s1 + $0x8] sm:$0xff]  ;;  %v26_v1 = vld [vmem:[%s758_s1 + $0x20] sm:$0xff]  ;;  %151 = vmatprep.mubr.f32.mxu0 %v466_v3  ;;  %v25_v5 = vld [vmem:[%s758_s1 + $0x18] sm:$0xff] }
   0x2   :  { %v22_v2 = vld [vmem:[%s758_s1] sm:$0xff]  ;;  %v401_v4 = vpack.c.bf16 %v26_v1, %v23_v0  ;;  %v29_v6 = vld [vmem:[%s758_s1 + $0x38] sm:$0xff]  ;;  %v32_v7 = vld [vmem:[%s758_s1 + $0x50] sm:$0xff] }
   0x3   :  { %v403_v8 = vpack.c.bf16 %v25_v5, %v22_v2  ;;  %v405_v9 = vpack.c.bf16 %v32_v7, %v29_v6  ;;  %v28_v10 = vld [vmem:[%s758_s1 + $0x30] sm:$0xff]  ;;  %v31_v11 = vld [vmem:[%s758_s1 + $0x48] sm:$0xff]  ;;  %v38_v13 = vld [vmem:[%s758_s1 + $0x80] sm:$0xff] }
   0x4   :  { %v35_v12 = vld [vmem:[%s758_s1 + $0x68] sm:$0xff]  ;;  %402 = vmatprep.subr.bf16.mxu0 %v401_v4  ;;  %v407_v14 = vpack.c.bf16 %v31_v11, %v28_v10  ;;  %v34_v15 = vld [vmem:[%s758_s1 + $0x60] sm:$0xff]  ;;  %v37_v17 = vld [vmem:[%s758_s1 + $0x78] sm:$0xff] }
   0x5   :  { %404 = vmatpush1.bf16.msra.mxu0 %v403_v8  ;;  %v409_v16 = vpack.c.bf16 %v38_v13, %v35_v12  ;;  %v24_v18 = vld [vmem:[%s758_s1 + $0x10] sm:$0xff]  ;;  %v27_v19 = vld [vmem:[%s758_s1 + $0x28] sm:$0xff]  ;;  %v41_v20 = vld [vmem:[%s758_s1 + $0x98] sm:$0xff]  ;;  %v411_v25 = vpack.c.bf16 %v37_v17, %v34_v15 }
   0x6   :  { %406 = vmatprep.subr.bf16.mxu0 %v405_v9  ;;  %v44_v21 = vld [vmem:[%s758_s1 + $0xb0] sm:$0xff]  ;;  %v433_v22 = vpack.c.bf16 %v27_v19, %v24_v18  ;;  %v30_v23 = vld [vmem:[%s758_s1 + $0x40] sm:$0xff]  ;;  %v33_v24 = vld [vmem:[%s758_s1 + $0x58] sm:$0xff]  ;;  %v72_v18 = vlaneseq }
   0x7   :  { %v40_v26 = vld [vmem:[%s758_s1 + $0x90] sm:$0xff]  ;;  %v437_v27 = vpack.c.bf16 %v33_v24, %v30_v23  ;;  %v413_v28 = vpack.c.bf16 %v44_v21, %v41_v20  ;;  %v43_v29 = vld [vmem:[%s758_s1 + $0xa8] sm:$0xff]  ;;  %v50_v33 = vld [vmem:[%s758_s1 + $0xe0] sm:$0xff] }
   0x8   :  { %434 = vmatprep.subr.bf16.mxu1 %v433_v22  ;;  %v36_v30 = vld [vmem:[%s758_s1 + $0x70] sm:$0xff]  ;;  %v39_v31 = vld [vmem:[%s758_s1 + $0x88] sm:$0xff]  ;;  %v42_v35 = vld [vmem:[%s758_s1 + $0xa0] sm:$0xff]  ;;  %v415_v37 = vpack.c.bf16 %v43_v29, %v40_v26  ;;  %v73_v19 = vshrl.u32 %v72_v18, 7 }
   0x9   :  { %408 = vmatpush1.bf16.msra.mxu0 %v407_v14  ;;  %436 = vmatpush3.bf16.msra.mxu1 %v433_v22  ;;  %v47_v32 = vld [vmem:[%s758_s1 + $0xc8] sm:$0xff]  ;;  %v441_v34 = vpack.c.bf16 %v39_v31, %v36_v30  ;;  %v45_v36 = vld [vmem:[%s758_s1 + $0xb8] sm:$0xff]  ;;  %v46_v39 = vld [vmem:[%s758_s1 + $0xc0] sm:$0xff] }
   0xa   :  { %410 = vmatprep.subr.bf16.mxu0 %v409_v16  ;;  %438 = vmatprep.subr.bf16.mxu1 %v437_v27  ;;  %v417_v38 = vpack.c.bf16 %v50_v33, %v47_v32  ;;  %v49_v40 = vld [vmem:[%s758_s1 + $0xd8] sm:$0xff]  ;;  %v56_v42 = vld [vmem:[%s758_s1 + $0x110] sm:$0xff]  ;;  %v445_v43 = vpack.c.bf16 %v45_v36, %v42_v35  ;;  %v14_v44 = vld [vmem:[%s759_s0] sm:$0xff]  ;;  %v74_v20 = vsub.s32 0, %v73_v19  ;;  %v78_v22 = vsub.s32 1, %v73_v19 }
   0xb   :  { %v53_v41 = vld [vmem:[%s758_s1 + $0xf8] sm:$0xff]  ;;  %v48_v45 = vld [vmem:[%s758_s1 + $0xd0] sm:$0xff]  ;;  %v51_v46 = vld [vmem:[%s758_s1 + $0xe8] sm:$0xff]  ;;  %389 = vmatprep.mubr.f32.mxu1 %v14_v44  ;;  %v419_v47 = vpack.c.bf16 %v49_v40, %v46_v39 }
   0xc   :  { %v421_v48 = vpack.c.bf16 %v56_v42, %v53_v41  ;;  %v52_v49 = vld [vmem:[%s758_s1 + $0xf0] sm:$0xff]  ;;  %v55_v50 = vld [vmem:[%s758_s1 + $0x108] sm:$0xff]  ;;  %v62_v52 = vld [vmem:[%s758_s1 + $0x140] sm:$0xff]  ;;  %v449_v53 = vpack.c.bf16 %v51_v46, %v48_v45 }
   0xd   :  { %412 = vmatpush1.bf16.msra.mxu0 %v411_v25  ;;  %440 = vmatpush3.bf16.msra.mxu1 %v437_v27  ;;  %v59_v51 = vld [vmem:[%s758_s1 + $0x128] sm:$0xff]  ;;  %v54_v54 = vld [vmem:[%s758_s1 + $0x100] sm:$0xff]  ;;  %v57_v55 = vld [vmem:[%s758_s1 + $0x118] sm:$0xff]  ;;  %v423_v56 = vpack.c.bf16 %v55_v50, %v52_v49  ;;  %v82_v25 = vsub.s32 2, %v73_v19 }
   0xe   :  { %414 = vmatprep.subr.bf16.mxu0 %v413_v28  ;;  %442 = vmatprep.subr.bf16.mxu1 %v441_v34  ;;  %v425_v57 = vpack.c.bf16 %v62_v52, %v59_v51  ;;  %v58_v58 = vld [vmem:[%s758_s1 + $0x120] sm:$0xff]  ;;  %v61_v59 = vld [vmem:[%s758_s1 + $0x138] sm:$0xff]  ;;  %v68_v61 = vld [vmem:[%s758_s1 + $0x170] sm:$0xff]  ;;  %v453_v62 = vpack.c.bf16 %v57_v55, %v54_v54 }
   0xf   :  { %v65_v60 = vld [vmem:[%s758_s1 + $0x158] sm:$0xff]  ;;  %v60_v63 = vld [vmem:[%s758_s1 + $0x130] sm:$0xff]  ;;  %v63_v0 = vld [vmem:[%s758_s1 + $0x148] sm:$0xff]  ;;  %v427_v1 = vpack.c.bf16 %v61_v59, %v58_v58 }
  0x10   :  { %v429_v2 = vpack.c.bf16 %v68_v61, %v65_v60  ;;  %v64_v4 = vld [vmem:[%s758_s1 + $0x150] sm:$0xff]  ;;  %v67_v5 = vld [vmem:[%s758_s1 + $0x168] sm:$0xff]  ;;  %v457_v6 = vpack.c.bf16 %v63_v0, %v60_v63  ;;  %v66_v7 = vld [vmem:[%s758_s1 + $0x160] sm:$0xff] }
  0x11   :  { %416 = vmatpush1.bf16.msra.mxu0 %v415_v37  ;;  %444 = vmatpush3.bf16.msra.mxu1 %v441_v34  ;;  %v69_v8 = vld [vmem:[%s758_s1 + $0x178] sm:$0xff]  ;;  %v431_v9 = vpack.c.bf16 %v67_v5, %v64_v4  ;;  %v15_v11 = vld [vmem:[%s759_s0 + $0x8] sm:$0xff]  ;;  %v16_v12 = vld [vmem:[%s759_s0 + $0x10] sm:$0xff] }
  0x12   :  { %418 = vmatprep.subr.bf16.mxu0 %v417_v38  ;;  %446 = vmatprep.subr.bf16.mxu1 %v445_v43  ;;  %v461_v10 = vpack.c.bf16 %v69_v8, %v66_v7  ;;  %v17_v13 = vld [vmem:[%s759_s0 + $0x18] sm:$0xff]  ;;  %v18_v14 = vld [vmem:[%s759_s0 + $0x20] sm:$0xff]  ;;  %v19_v15 = vld [vmem:[%s759_s0 + $0x28] sm:$0xff] }
  0x13   :  { %v20_v16 = vld [vmem:[%s759_s0 + $0x30] sm:$0xff]  ;;  %v21_v17 = vld [vmem:[%s759_s0 + $0x38] sm:$0xff]  ;;  %v70_v21 = vld [vmem:[%s760_s2] sm:$0x7] }
  0x14   :  { %v666_v23 = vrot.slane %v70_v21, %v74_v20  ;;  %v668_v24 = vrot.slane %v70_v21, %v78_v22  ;;  %v83_v29 = vrot.slane %v70_v21, %v82_v25 }
  0x15   :  { %420 = vmatpush1.bf16.msra.mxu0 %v419_v47  ;;  %448 = vmatpush3.bf16.msra.mxu1 %v445_v43 }
  0x16   :  { %422 = vmatprep.subr.bf16.mxu0 %v421_v48  ;;  %450 = vmatprep.subr.bf16.mxu1 %v449_v53 }
  0x19   :  { %424 = vmatpush1.bf16.msra.mxu0 %v423_v56  ;;  %452 = vmatpush3.bf16.msra.mxu1 %v449_v53 }
  0x1a   :  { %426 = vmatprep.subr.bf16.mxu0 %v425_v57  ;;  %454 = vmatprep.subr.bf16.mxu1 %v453_v62 }
  0x1d   :  { %428 = vmatpush1.bf16.msra.mxu0 %v427_v1  ;;  %456 = vmatpush3.bf16.msra.mxu1 %v453_v62 }
  0x1e   :  { %430 = vmatprep.subr.bf16.mxu0 %v429_v2  ;;  %458 = vmatprep.subr.bf16.mxu1 %v457_v6 }
  0x21   :  { %432 = vmatpush1.bf16.msra.mxu0 %v431_v9  ;;  %460 = vmatpush3.bf16.msra.mxu1 %v457_v6 }
  0x22   :  { %462 = vmatprep.subr.bf16.mxu1 %v461_v10 }
  0x24   :  { %152 = vmatmul.mubr.f32.vlgmr.msra.gmra.mrb[0].mxu0 %v14_v44 }
  0x25   :  { %157 = vmatprep.mubr.f32.mxu0 %v466_v3  ;;  %464 = vmatpush3.bf16.msra.mxu1 %v461_v10 }
  0x28   :  { %158 = vmatmul.mubr.f32.gmra.mrb[2].mxu0 %v15_v11  ;;  %390 = vmatmul.mubr.f32.vlgmr.msra.gmra.mrb[0].mxu1 %v15_v11 }
  0x29   :  { %163 = vmatprep.mubr.f32.mxu0 %v466_v3  ;;  %392 = vmatprep.mubr.f32.mxu1 %v16_v12 }
  0x2c   :  { %164 = vmatmul.mubr.f32.gmra.mrb[4].mxu0 %v16_v12  ;;  %393 = vmatmul.mubr.f32.gmra.mrb[2].mxu1 %v17_v13 }
  0x2d   :  { %169 = vmatprep.mubr.f32.mxu0 %v466_v3  ;;  %395 = vmatprep.mubr.f32.mxu1 %v18_v14 }
  0x30   :  { %170 = vmatmul.mubr.f32.gmra.mrb[6].mxu0 %v17_v13  ;;  %396 = vmatmul.mubr.f32.gmra.mrb[4].mxu1 %v19_v15 }
  0x31   :  { %175 = vmatprep.mubr.f32.mxu0 %v466_v3  ;;  %398 = vmatprep.mubr.f32.mxu1 %v20_v16 }
  0x34   :  { %176 = vmatmul.mubr.f32.gmra.mrb[8].mxu0 %v18_v14  ;;  %399 = vmatmul.mubr.f32.gmra.mrb[6].mxu1 %v21_v17 }
  0x35   :  { %181 = vmatprep.mubr.f32.mxu0 %v466_v3 }
  0x38   :  { %182 = vmatmul.mubr.f32.gmra.mrb[10].mxu0 %v19_v15 }
  0x39   :  { %187 = vmatprep.mubr.f32.mxu0 %v466_v3 }
  0x3c   :  { %188 = vmatmul.mubr.f32.gmra.mrb[12].mxu0 %v20_v16 }
  0x3d   :  { %193 = vmatprep.mubr.f32.mxu0 %v466_v3 }
  0x40   :  { %194 = vmatmul.mubr.f32.gmra.mrb[14].mxu0 %v21_v17 }
  0xf7   :  { %v153_v26 = vpop.f32.mrb[0].mxu0 }
  0xf8   :  { %v154_v27 = vadd.f32 %v153_v26, %v666_v23  ;;  %v155_v28 = vpop.f32.mrb[1].mxu0 }
  0xf9   :  { %v156_v3 = vadd.f32 %v155_v28, %v668_v24 }
  0xfa   :  { %305 = vst [vmem:[%s761_s3] sm:$0xff] %v154_v27 }
  0xfb   :  { %306 = vst [vmem:[%s761_s3 + $0x8] sm:$0xff] %v156_v3  ;;  %v159_v30 = vpop.f32.mrb[2].mxu0  ;;  %v391_v33 = vpop.f32.mrb[0].mxu1 }
  0xfc   :  { %v160_v31 = vadd.f32 %v159_v30, %v666_v23  ;;  %v161_v32 = vpop.f32.mrb[3].mxu0  ;;  %v272_v35 = vadd.f32 %v391_v33, %v83_v29  ;;  %v266_v36 = vpop.f32.mrb[1].mxu1 }
  0xfd   :  { %v162_v34 = vadd.f32 %v161_v32, %v668_v24  ;;  %v267_v37 = vadd.f32 %v266_v36, %v83_v29 }
  0xfe   :  { %308 = vst [vmem:[%s761_s3 + $0x18] sm:$0xff] %v160_v31  ;;  %310 = vst [vmem:[%s761_s3 + $0x28] sm:$0xff] %v272_v35 }
  0xff   :  { %309 = vst [vmem:[%s761_s3 + $0x20] sm:$0xff] %v162_v34  ;;  %v165_v38 = vpop.f32.mrb[4].mxu0  ;;  %307 = vst [vmem:[%s761_s3 + $0x10] sm:$0xff] %v267_v37  ;;  %v394_v41 = vpop.f32.mrb[2].mxu1 }
 0x100   :  { %v166_v39 = vadd.f32 %v165_v38, %v666_v23  ;;  %v167_v40 = vpop.f32.mrb[5].mxu0  ;;  %v282_v43 = vadd.f32 %v394_v41, %v83_v29  ;;  %v276_v44 = vpop.f32.mrb[3].mxu1 }
 0x101   :  { %v168_v42 = vadd.f32 %v167_v40, %v668_v24  ;;  %v277_v45 = vadd.f32 %v276_v44, %v83_v29 }
 0x102   :  { %311 = vst [vmem:[%s761_s3 + $0x30] sm:$0xff] %v166_v39  ;;  %316 = vst [vmem:[%s761_s3 + $0x58] sm:$0xff] %v282_v43 }
 0x103   :  { %312 = vst [vmem:[%s761_s3 + $0x38] sm:$0xff] %v168_v42  ;;  %v171_v46 = vpop.f32.mrb[6].mxu0  ;;  %313 = vst [vmem:[%s761_s3 + $0x40] sm:$0xff] %v277_v45  ;;  %v397_v49 = vpop.f32.mrb[4].mxu1 }
 0x104   :  { %v172_v47 = vadd.f32 %v171_v46, %v666_v23  ;;  %v173_v48 = vpop.f32.mrb[7].mxu0  ;;  %v292_v51 = vadd.f32 %v397_v49, %v83_v29  ;;  %v286_v52 = vpop.f32.mrb[5].mxu1 }
 0x105   :  { %v174_v50 = vadd.f32 %v173_v48, %v668_v24  ;;  %v287_v53 = vadd.f32 %v286_v52, %v83_v29 }
 0x106   :  { %314 = vst [vmem:[%s761_s3 + $0x48] sm:$0xff] %v172_v47  ;;  %322 = vst [vmem:[%s761_s3 + $0x88] sm:$0xff] %v292_v51 }
 0x107   :  { %315 = vst [vmem:[%s761_s3 + $0x50] sm:$0xff] %v174_v50  ;;  %v177_v54 = vpop.f32.mrb[8].mxu0  ;;  %319 = vst [vmem:[%s761_s3 + $0x70] sm:$0xff] %v287_v53  ;;  %v400_v57 = vpop.f32.mrb[6].mxu1 }
 0x108   :  { %v178_v55 = vadd.f32 %v177_v54, %v666_v23  ;;  %v179_v56 = vpop.f32.mrb[9].mxu0  ;;  %v302_v59 = vadd.f32 %v400_v57, %v83_v29  ;;  %v296_v60 = vpop.f32.mrb[7].mxu1 }
 0x109   :  { %v180_v58 = vadd.f32 %v179_v56, %v668_v24  ;;  %v297_v61 = vadd.f32 %v296_v60, %v83_v29 }
 0x10a   :  { %317 = vst [vmem:[%s761_s3 + $0x60] sm:$0xff] %v178_v55  ;;  %328 = vst [vmem:[%s761_s3 + $0xb8] sm:$0xff] %v302_v59 }
 0x10b   :  { %318 = vst [vmem:[%s761_s3 + $0x68] sm:$0xff] %v180_v58  ;;  %v183_v62 = vpop.f32.mrb[10].mxu0  ;;  %325 = vst [vmem:[%s761_s3 + $0xa0] sm:$0xff] %v297_v61 }
 0x10c   :  { %v184_v63 = vadd.f32 %v183_v62, %v666_v23  ;;  %v185_v0 = vpop.f32.mrb[11].mxu0 }
 0x10d   :  { %v186_v1 = vadd.f32 %v185_v0, %v668_v24 }
 0x10e   :  { %320 = vst [vmem:[%s761_s3 + $0x78] sm:$0xff] %v184_v63 }
 0x10f   :  { %321 = vst [vmem:[%s761_s3 + $0x80] sm:$0xff] %v186_v1  ;;  %v189_v2 = vpop.f32.mrb[12].mxu0 }
 0x110   :  { %v190_v4 = vadd.f32 %v189_v2, %v666_v23  ;;  %v191_v5 = vpop.f32.mrb[13].mxu0 }
 0x111   :  { %v192_v6 = vadd.f32 %v191_v5, %v668_v24 }
 0x112   :  { %323 = vst [vmem:[%s761_s3 + $0x90] sm:$0xff] %v190_v4 }
 0x113   :  { %324 = vst [vmem:[%s761_s3 + $0x98] sm:$0xff] %v192_v6  ;;  %v195_v7 = vpop.f32.mrb[14].mxu0 }
 0x114   :  { %v196_v8 = vadd.f32 %v195_v7, %v666_v23  ;;  %v197_v9 = vpop.f32.mrb[15].mxu0 }
 0x115   :  { %v198_v10 = vadd.f32 %v197_v9, %v668_v24 }
 0x116   :  { %326 = vst [vmem:[%s761_s3 + $0xa8] sm:$0xff] %v196_v8 }
 0x117   :  { %327 = vst [vmem:[%s761_s3 + $0xb0] sm:$0xff] %v198_v10 }

// kernel: gru_forward.6
= control target key start
LH: loop header
LB: loop body
LE: loop exit
PB: predicated region body
PF: predicated region fallthrough
CT: control target
= control target key end

     0   :  { %v2434_v3 = vmov 0.0|0.0   ;;  %v2435_v4 = vmov 0.0   ;;  %vm2436_vm0 = vmmov 0   ;;  %s3104_s1 = inlined_call_operand.vmem [shape: f32[128,384], index: 1, kind: input, shape index: {}]   ;;  %s3105_s2 = inlined_call_operand.vmem [shape: f32[1,384], index: 2, kind: input, shape index: {}]   ;;  %s3106_s0 = inlined_call_operand.vmem [shape: f32[8,8,384], index: 0, kind: input, shape index: {}]   ;;  %s3107_s3 = inlined_call_operand.vmem [shape: f32[8,8,128], index: 3, kind: output, shape index: {0}]   ;;  %s3108_s4 = inlined_call_operand.vmem [shape: f32[8,128], index: 4, kind: output, shape index: {1}]  }
   0x1   :  { %v23_v0 = vld [vmem:[%s3104_s1 + $0x8] sm:$0xff]  ;;  %v26_v1 = vld [vmem:[%s3104_s1 + $0x20] sm:$0xff]  ;;  %1935 = vmatprep.subr.bf16.mxu1 %v2434_v3  ;;  %155 = vmatprep.mubr.f32.mxu0 %v2435_v4  ;;  %v25_v6 = vld [vmem:[%s3104_s1 + $0x18] sm:$0xff] }
   0x2   :  { %v22_v2 = vld [vmem:[%s3104_s1] sm:$0xff]  ;;  %v2473_v5 = vpack.c.bf16 %v26_v1, %v23_v0  ;;  %v29_v7 = vld [vmem:[%s3104_s1 + $0x38] sm:$0xff]  ;;  %v32_v8 = vld [vmem:[%s3104_s1 + $0x50] sm:$0xff]  ;;  %1655 = vmatprep.mubr.msk.f32.mxu1 %vm2436_vm0, %v2435_v4 }
   0x3   :  { %v2486_v9 = vpack.c.bf16 %v25_v6, %v22_v2  ;;  %v2488_v10 = vpack.c.bf16 %v32_v8, %v29_v7  ;;  %v28_v11 = vld [vmem:[%s3104_s1 + $0x30] sm:$0xff]  ;;  %v31_v12 = vld [vmem:[%s3104_s1 + $0x48] sm:$0xff]  ;;  %v38_v14 = vld [vmem:[%s3104_s1 + $0x80] sm:$0xff] }
   0x4   :  { %v35_v13 = vld [vmem:[%s3104_s1 + $0x68] sm:$0xff]  ;;  %1904 = vmatprep.subr.bf16.mxu0 %v2473_v5  ;;  %v2504_v15 = vpack.c.bf16 %v31_v12, %v28_v11  ;;  %v34_v17 = vld [vmem:[%s3104_s1 + $0x60] sm:$0xff]  ;;  %v37_v18 = vld [vmem:[%s3104_s1 + $0x78] sm:$0xff] }
   0x5   :  { %1906 = vmatpush1.bf16.msra.mxu0 %v2486_v9  ;;  %v2507_v16 = vpack.c.bf16 %v38_v14, %v35_v13  ;;  %v41_v19 = vld [vmem:[%s3104_s1 + $0x98] sm:$0xff]  ;;  %v44_v20 = vld [vmem:[%s3104_s1 + $0xb0] sm:$0xff]  ;;  %v2522_v21 = vpack.c.bf16 %v37_v18, %v34_v17  ;;  %v43_v24 = vld [vmem:[%s3104_s1 + $0xa8] sm:$0xff]  ;;  %v76_v17 = vlaneseq }
   0x6   :  { %1908 = vmatprep.subr.bf16.mxu0 %v2488_v10  ;;  %v2525_v22 = vpack.c.bf16 %v44_v20, %v41_v19  ;;  %v40_v23 = vld [vmem:[%s3104_s1 + $0x90] sm:$0xff]  ;;  %v47_v25 = vld [vmem:[%s3104_s1 + $0xc8] sm:$0xff]  ;;  %v50_v26 = vld [vmem:[%s3104_s1 + $0xe0] sm:$0xff] }
   0x7   :  { %v24_v27 = vld [vmem:[%s3104_s1 + $0x10] sm:$0xff]  ;;  %v27_v28 = vld [vmem:[%s3104_s1 + $0x28] sm:$0xff]  ;;  %v30_v30 = vld [vmem:[%s3104_s1 + $0x40] sm:$0xff]  ;;  %v2554_v32 = vpack.c.bf16 %v43_v24, %v40_v23  ;;  %v2557_v33 = vpack.c.bf16 %v50_v26, %v47_v25  ;;  %v77_v18 = vshrl.u32 %v76_v17, 7 }
   0x8   :  { %v2545_v29 = vpack.c.bf16 %v27_v28, %v24_v27  ;;  %v33_v31 = vld [vmem:[%s3104_s1 + $0x58] sm:$0xff]  ;;  %v46_v34 = vld [vmem:[%s3104_s1 + $0xc0] sm:$0xff]  ;;  %v56_v38 = vld [vmem:[%s3104_s1 + $0x110] sm:$0xff] }
   0x9   :  { %1910 = vmatpush1.bf16.msra.mxu0 %v2504_v15  ;;  %v49_v35 = vld [vmem:[%s3104_s1 + $0xd8] sm:$0xff]  ;;  %v2569_v37 = vpack.c.bf16 %v33_v31, %v30_v30  ;;  %v36_v39 = vld [vmem:[%s3104_s1 + $0x70] sm:$0xff]  ;;  %v39_v40 = vld [vmem:[%s3104_s1 + $0x88] sm:$0xff]  ;;  %v78_v19 = vsub.s32 0, %v77_v18  ;;  %v82_v23 = vsub.s32 1, %v77_v18 }
   0xa   :  { %1912 = vmatprep.subr.bf16.mxu0 %v2507_v16  ;;  %v53_v36 = vld [vmem:[%s3104_s1 + $0xf8] sm:$0xff]  ;;  %1937 = vmatpush3.bf16.msra.mxu1 %v2545_v29  ;;  %v2582_v41 = vpack.c.bf16 %v49_v35, %v46_v34  ;;  %v52_v43 = vld [vmem:[%s3104_s1 + $0xf0] sm:$0xff]  ;;  %v55_v44 = vld [vmem:[%s3104_s1 + $0x108] sm:$0xff]  ;;  %v2597_v46 = vpack.c.bf16 %v39_v40, %v36_v39 }
   0xb   :  { %1938 = vmatprep.subr.bf16.mxu1 %v2434_v3  ;;  %v2585_v42 = vpack.c.bf16 %v56_v38, %v53_v36  ;;  %v59_v45 = vld [vmem:[%s3104_s1 + $0x128] sm:$0xff]  ;;  %v62_v47 = vld [vmem:[%s3104_s1 + $0x140] sm:$0xff]  ;;  %v45_v49 = vld [vmem:[%s3104_s1 + $0xb8] sm:$0xff]  ;;  %v2610_v50 = vpack.c.bf16 %v55_v44, %v52_v43 }
   0xc   :  { %v42_v48 = vld [vmem:[%s3104_s1 + $0xa0] sm:$0xff]  ;;  %v2613_v51 = vpack.c.bf16 %v62_v47, %v59_v45  ;;  %v61_v53 = vld [vmem:[%s3104_s1 + $0x138] sm:$0xff]  ;;  %v68_v56 = vld [vmem:[%s3104_s1 + $0x170] sm:$0xff]  ;;  %v86_v47 = vsub.s32 2, %v77_v18 }
   0xd   :  { %1914 = vmatpush1.bf16.msra.mxu0 %v2522_v21  ;;  %v58_v52 = vld [vmem:[%s3104_s1 + $0x120] sm:$0xff]  ;;  %v65_v54 = vld [vmem:[%s3104_s1 + $0x158] sm:$0xff]  ;;  %v2625_v55 = vpack.c.bf16 %v45_v49, %v42_v48  ;;  %v48_v57 = vld [vmem:[%s3104_s1 + $0xd0] sm:$0xff] }
   0xe   :  { %1916 = vmatprep.subr.bf16.mxu0 %v2525_v22  ;;  %1940 = vmatpush3.bf16.msra.mxu1 %v2569_v37  ;;  %v51_v58 = vld [vmem:[%s3104_s1 + $0xe8] sm:$0xff]  ;;  %v2638_v59 = vpack.c.bf16 %v61_v53, %v58_v52  ;;  %v2641_v60 = vpack.c.bf16 %v68_v56, %v65_v54  ;;  %v64_v61 = vld [vmem:[%s3104_s1 + $0x150] sm:$0xff]  ;;  %v54_v0 = vld [vmem:[%s3104_s1 + $0x100] sm:$0xff] }
   0xf   :  { %1941 = vmatprep.subr.bf16.mxu1 %v2434_v3  ;;  %v67_v62 = vld [vmem:[%s3104_s1 + $0x168] sm:$0xff]  ;;  %v2650_v63 = vpack.c.bf16 %v51_v58, %v48_v57  ;;  %v57_v1 = vld [vmem:[%s3104_s1 + $0x118] sm:$0xff]  ;;  %v60_v7 = vld [vmem:[%s3104_s1 + $0x130] sm:$0xff] }
  0x10   :  { %v2660_v2 = vpack.c.bf16 %v67_v62, %v64_v61  ;;  %v2664_v6 = vpack.c.bf16 %v57_v1, %v54_v0  ;;  %v63_v8 = vld [vmem:[%s3104_s1 + $0x148] sm:$0xff]  ;;  %v66_v12 = vld [vmem:[%s3104_s1 + $0x160] sm:$0xff]  ;;  %v69_v13 = vld [vmem:[%s3104_s1 + $0x178] sm:$0xff] }
  0x11   :  { %1918 = vmatpush1.bf16.msra.mxu0 %v2554_v32  ;;  %v2675_v11 = vpack.c.bf16 %v63_v8, %v60_v7  ;;  %v2689_v14 = vpack.c.bf16 %v69_v13, %v66_v12  ;;  %v70_v20 = vld [vmem:[%s3105_s2] sm:$0x7]  ;;  %v73_v35 = vld [vmem:[%s3106_s0 + $0x8] sm:$0xff]  ;;  %v74_v56 = vld [vmem:[%s3106_s0 + $0x10] sm:$0xff] }
  0x12   :  { %1920 = vmatprep.subr.bf16.mxu0 %v2557_v33  ;;  %1943 = vmatpush3.bf16.msra.mxu1 %v2597_v46  ;;  %v2731_v24 = vrot.slane %v70_v20, %v78_v19  ;;  %v2733_v25 = vrot.slane %v70_v20, %v82_v23  ;;  %v72_v26 = vld [vmem:[%s3106_s0] sm:$0xff]  ;;  %v2743_v48 = vrot.slane %v70_v20, %v86_v47  ;;  %v1445_v12 = vld [vmem:[%s3106_s0 + $0x18] sm:$0xff] }
  0x13   :  { %1944 = vmatprep.subr.bf16.mxu1 %v2434_v3 }
  0x15   :  { %1922 = vmatpush1.bf16.msra.mxu0 %v2582_v41 }
  0x16   :  { %1924 = vmatprep.subr.bf16.mxu0 %v2585_v42  ;;  %1946 = vmatpush3.bf16.msra.mxu1 %v2625_v55 }
  0x17   :  { %1947 = vmatprep.subr.bf16.mxu1 %v2434_v3 }
  0x19   :  { %1926 = vmatpush1.bf16.msra.mxu0 %v2610_v50 }
  0x1a   :  { %1928 = vmatprep.subr.bf16.mxu0 %v2613_v51  ;;  %1949 = vmatpush3.bf16.msra.mxu1 %v2650_v63 }
  0x1b   :  { %1950 = vmatprep.subr.bf16.mxu1 %v2434_v3 }
  0x1d   :  { %1930 = vmatpush1.bf16.msra.mxu0 %v2638_v59 }
  0x1e   :  { %1932 = vmatprep.subr.bf16.mxu0 %v2641_v60  ;;  %1952 = vmatpush3.bf16.msra.mxu1 %v2664_v6 }
  0x1f   :  { %1953 = vmatprep.subr.bf16.mxu1 %v2434_v3 }
  0x21   :  { %1934 = vmatpush1.bf16.msra.mxu0 %v2660_v2 }
  0x22   :  { %1960 = vmatprep.subr.bf16.mxu0 %v2473_v5  ;;  %1955 = vmatpush3.bf16.msra.mxu1 %v2675_v11 }
  0x23   :  { %1956 = vmatprep.subr.bf16.mxu1 %v2434_v3 }
  0x24   :  { %156 = vmatmul.mubr.f32.vlgmr.msra.gmra.mrb[0].mxu0 %v2435_v4 }
  0x25   :  { %1962 = vmatpush1.bf16.msra.mxu0 %v2486_v9  ;;  %322 = vmatprep.mubr.f32.mxu0 %v2435_v4 }
  0x26   :  { %1964 = vmatprep.subr.bf16.mxu0 %v2488_v10  ;;  %1958 = vmatpush3.bf16.msra.mxu1 %v2689_v14 }
  0x27   :  { %1991 = vmatprep.subr.bf16.mxu1 %v2434_v3 }
  0x29   :  { %1966 = vmatpush1.bf16.msra.mxu0 %v2504_v15  ;;  %1656 = vmatmul.mubr.f32.vlgmr.msra.gmra.mrb[0].mxu1 %v2435_v4 }
  0x2a   :  { %1968 = vmatprep.subr.bf16.mxu0 %v2507_v16  ;;  %1993 = vmatpush3.bf16.msra.mxu1 %v2545_v29 }
  0x2b   :  { %1994 = vmatprep.subr.bf16.mxu1 %v2434_v3  ;;  %1690 = vmatprep.mubr.msk.f32.mxu1 %vm2436_vm0, %v2435_v4 }
  0x2d   :  { %1970 = vmatpush1.bf16.msra.mxu0 %v2522_v21 }
  0x2e   :  { %1972 = vmatprep.subr.bf16.mxu0 %v2525_v22  ;;  %1996 = vmatpush3.bf16.msra.mxu1 %v2569_v37 }
  0x2f   :  { %1997 = vmatprep.subr.bf16.mxu1 %v2434_v3 }
  0x31   :  { %1974 = vmatpush1.bf16.msra.mxu0 %v2554_v32 }
  0x32   :  { %1976 = vmatprep.subr.bf16.mxu0 %v2557_v33  ;;  %1999 = vmatpush3.bf16.msra.mxu1 %v2597_v46 }
  0x33   :  { %2000 = vmatprep.subr.bf16.mxu1 %v2434_v3 }
  0x35   :  { %1978 = vmatpush1.bf16.msra.mxu0 %v2582_v41 }
  0x36   :  { %1980 = vmatprep.subr.bf16.mxu0 %v2585_v42  ;;  %2002 = vmatpush3.bf16.msra.mxu1 %v2625_v55 }
  0x37   :  { %2003 = vmatprep.subr.bf16.mxu1 %v2434_v3 }
  0x39   :  { %1982 = vmatpush1.bf16.msra.mxu0 %v2610_v50 }
  0x3a   :  { %1984 = vmatprep.subr.bf16.mxu0 %v2613_v51  ;;  %2005 = vmatpush3.bf16.msra.mxu1 %v2650_v63 }
  0x3b   :  { %2006 = vmatprep.subr.bf16.mxu1 %v2434_v3 }
  0x3d   :  { %1986 = vmatpush1.bf16.msra.mxu0 %v2638_v59 }
  0x3e   :  { %1988 = vmatprep.subr.bf16.mxu0 %v2641_v60  ;;  %2008 = vmatpush3.bf16.msra.mxu1 %v2664_v6 }
  0x3f   :  { %2009 = vmatprep.subr.bf16.mxu1 %v2434_v3 }
  0x41   :  { %1990 = vmatpush1.bf16.msra.mxu0 %v2660_v2 }
  0x42   :  { %2016 = vmatprep.subr.bf16.mxu0 %v2473_v5  ;;  %2011 = vmatpush3.bf16.msra.mxu1 %v2675_v11 }
  0x43   :  { %2012 = vmatprep.subr.bf16.mxu1 %v2434_v3 }
  0x46   :  { %2014 = vmatpush3.bf16.msra.mxu1 %v2689_v14 }
  0x47   :  { %2047 = vmatprep.subr.bf16.mxu1 %v2434_v3 }
  0xf7   :  { %v157_v27 = vpop.f32.mrb[0].mxu0 }
  0xf8   :  { %v158_v28 = vadd.f32 %v157_v27, %v2731_v24  ;;  %v159_v30 = vpop.f32.mrb[1].mxu0  ;;  %v1446_v27 = vld [vmem:[%s3106_s0 + $0x20] sm:$0xff] }
  0xf9   :  { %v160_v31 = vadd.f32 %v159_v30, %v2733_v25 }
  0xfa   :  { %v232_v34 = vadd.f32 %v158_v28, %v72_v26 }
  0xfb   :  { %v239_v38 = vadd.f32 %v160_v31, %v73_v35 }
  0xfc   :  { %v1443_v36 = vmul.f32 -1.442695, %v232_v34  ;;  %v228_v39 = vpop.f32.mrb[0].mxu1 }
  0xfd   :  { %v1444_v40 = vmul.f32 -1.442695, %v239_v38  ;;  %v1657_v43 = vpop.f32.mrb[1].mxu1  ;;  %v229_v53 = vadd.f32 %v228_v39, %v2743_v48 }
  0xfe   :  { %2354 = vpow2.f32 %v1443_v36  ;;  %v1447_v43 = vld [vmem:[%s3106_s0 + $0x28] sm:$0xff] }
  0xff   :  { %2356 = vpow2.f32 %v1444_v40 }
 0x108   :  { %v2355_v44 = vpop.eup %2354 }
 0x109   :  { %v236_v45 = vadd.f32 1.0, %v2355_v44  ;;  %v2357_v49 = vpop.eup %2356 }
 0x10a   :  { %v243_v52 = vadd.f32 1.0, %v2357_v49 }
 0x10b   :  { %2358 = vrcp.f32 %v236_v45 }
 0x10c   :  { %2360 = vrcp.f32 %v243_v52 }
 0x115   :  { %v2359_v54 = vpop.eup %2358 }
 0x116   :  { %v246_v57 = vmul.f32 %v2359_v54, %v229_v53  ;;  %v2361_v61 = vpop.eup %2360 }
 0x117   :  { %v249_v62 = vsub.f32 1.0, %v2361_v61  ;;  %v251_v7 = vmul.f32 0.0, %v2361_v61 }
 0x118   :  { %v247_v58 = vadd.f32 %v246_v57, %v74_v56  ;;  %v1451_v57 = vld [vmem:[%s3106_s0 + $0x30] sm:$0xff] }
 0x11a   :  { %2362 = vtanh.f32 %v247_v58 }
 0x124   :  { %v2363_v0 = vpop.eup %2362 }
 0x125   :  { %v250_v1 = vmul.f32 %v2363_v0, %v249_v62 }
 0x127   :  { %v2749_v8 = vadd.f32 %v251_v7, %v250_v1 }
 0x129   :  { %253 = vst [vmem:[%s3107_s3] sm:$0xff] %v2749_v8  ;;  %323 = vmatmul.mubr.f32.vlgmr.msra.gmra.mrb[2].mxu0 %v2749_v8  ;;  %1691 = vmatmul.mubr.f32.vlgmr.msra.gmra.mrb[2].mxu1 %v2749_v8 }
 0x12a   :  { %2018 = vmatpush1.bf16.msra.mxu0 %v2486_v9  ;;  %2049 = vmatpush3.bf16.msra.mxu1 %v2545_v29 }
 0x12b   :  { %2020 = vmatprep.subr.bf16.mxu0 %v2488_v10  ;;  %2050 = vmatprep.subr.bf16.mxu1 %v2434_v3 }
 0x12c   :  { %490 = vmatprep.mubr.f32.mxu0 %v2435_v4  ;;  %1725 = vmatprep.mubr.msk.f32.mxu1 %vm2436_vm0, %v2435_v4 }
 0x12e   :  { %2022 = vmatpush1.bf16.msra.mxu0 %v2504_v15  ;;  %2052 = vmatpush3.bf16.msra.mxu1 %v2569_v37 }
 0x12f   :  { %2024 = vmatprep.subr.bf16.mxu0 %v2507_v16  ;;  %2053 = vmatprep.subr.bf16.mxu1 %v2434_v3 }
 0x132   :  { %2026 = vmatpush1.bf16.msra.mxu0 %v2522_v21  ;;  %2055 = vmatpush3.bf16.msra.mxu1 %v2597_v46 }
 0x133   :  { %2028 = vmatprep.subr.bf16.mxu0 %v2525_v22  ;;  %2056 = vmatprep.subr.bf16.mxu1 %v2434_v3 }
 0x136   :  { %2030 = vmatpush1.bf16.msra.mxu0 %v2554_v32  ;;  %2058 = vmatpush3.bf16.msra.mxu1 %v2625_v55 }
 0x137   :  { %2032 = vmatprep.subr.bf16.mxu0 %v2557_v33  ;;  %2059 = vmatprep.subr.bf16.mxu1 %v2434_v3 }
 0x13a   :  { %2034 = vmatpush1.bf16.msra.mxu0 %v2582_v41  ;;  %2061 = vmatpush3.bf16.msra.mxu1 %v2650_v63 }
 0x13b   :  { %2036 = vmatprep.subr.bf16.mxu0 %v2585_v42  ;;  %2062 = vmatprep.subr.bf16.mxu1 %v2434_v3 }
 0x13e   :  { %2038 = vmatpush1.bf16.msra.mxu0 %v2610_v50  ;;  %2064 = vmatpush3.bf16.msra.mxu1 %v2664_v6 }
 0x13f   :  { %2040 = vmatprep.subr.bf16.mxu0 %v2613_v51  ;;  %2065 = vmatprep.subr.bf16.mxu1 %v2434_v3 }
 0x142   :  { %2042 = vmatpush1.bf16.msra.mxu0 %v2638_v59  ;;  %2067 = vmatpush3.bf16.msra.mxu1 %v2675_v11 }
 0x143   :  { %2044 = vmatprep.subr.bf16.mxu0 %v2641_v60  ;;  %2068 = vmatprep.subr.bf16.mxu1 %v2434_v3 }
 0x146   :  { %2046 = vmatpush1.bf16.msra.mxu0 %v2660_v2  ;;  %2070 = vmatpush3.bf16.msra.mxu1 %v2689_v14 }
 0x147   :  { %2072 = vmatprep.subr.bf16.mxu0 %v2473_v5  ;;  %2103 = vmatprep.subr.bf16.mxu1 %v2434_v3 }
 0x1fc   :  { %v324_v13 = vpop.f32.mrb[2].mxu0  ;;  %v395_v17 = vpop.f32.mrb[2].mxu1 }
 0x1fd   :  { %v325_v18 = vadd.f32 %v324_v13, %v2731_v24  ;;  %v326_v19 = vpop.f32.mrb[3].mxu0  ;;  %v1692_v20 = vpop.f32.mrb[3].mxu1  ;;  %v396_v39 = vadd.f32 %v395_v17, %v2743_v48 }
 0x1fe   :  { %v327_v23 = vadd.f32 %v326_v19, %v2733_v25 }
 0x1ff   :  { %v399_v26 = vadd.f32 %v1445_v12, %v325_v18  ;;  %v1452_v12 = vld [vmem:[%s3106_s0 + $0x38] sm:$0xff] }
 0x200   :  { %v406_v30 = vadd.f32 %v1446_v27, %v327_v23 }
 0x201   :  { %v1448_v28 = vmul.f32 -1.442695, %v399_v26 }
 0x202   :  { %v1449_v31 = vmul.f32 -1.442695, %v406_v30  ;;  %v1453_v30 = vld [vmem:[%s3106_s0 + $0x40] sm:$0xff] }
 0x203   :  { %2364 = vpow2.f32 %v1448_v28 }
 0x204   :  { %2366 = vpow2.f32 %v1449_v31 }
 0x20d   :  { %v2365_v34 = vpop.eup %2364 }
 0x20e   :  { %v403_v35 = vadd.f32 1.0, %v2365_v34  ;;  %v2367_v36 = vpop.eup %2366 }
 0x20f   :  { %v410_v38 = vadd.f32 1.0, %v2367_v36 }
 0x210   :  { %2368 = vrcp.f32 %v403_v35 }
 0x211   :  { %2370 = vrcp.f32 %v410_v38 }
 0x21a   :  { %v2369_v40 = vpop.eup %2368 }
 0x21b   :  { %v413_v44 = vmul.f32 %v2369_v40, %v396_v39  ;;  %v2371_v47 = vpop.eup %2370 }
 0x21c   :  { %v416_v49 = vsub.f32 1.0, %v2371_v47  ;;  %v418_v54 = vmul.f32 %v2371_v47, %v2749_v8 }
 0x21d   :  { %v414_v45 = vadd.f32 %v1447_v43, %v413_v44  ;;  %v1457_v44 = vld [vmem:[%s3106_s0 + $0x48] sm:$0xff] }
 0x21f   :  { %2372 = vtanh.f32 %v414_v45 }
 0x229   :  { %v2373_v52 = vpop.eup %2372 }
 0x22a   :  { %v417_v53 = vmul.f32 %v2373_v52, %v416_v49 }
 0x22c   :  { %v2805_v56 = vadd.f32 %v418_v54, %v417_v53 }
 0x22e   :  { %1450 = vst [vmem:[%s3107_s3 + $0x8] sm:$0xff] %v2805_v56  ;;  %491 = vmatmul.mubr.f32.vlgmr.msra.gmra.mrb[4].mxu0 %v2805_v56  ;;  %1726 = vmatmul.mubr.f32.vlgmr.msra.gmra.mrb[4].mxu1 %v2805_v56 }
 0x22f   :  { %2074 = vmatpush1.bf16.msra.mxu0 %v2486_v9  ;;  %2105 = vmatpush3.bf16.msra.mxu1 %v2545_v29 }
 0x230   :  { %2076 = vmatprep.subr.bf16.mxu0 %v2488_v10  ;;  %2106 = vmatprep.subr.bf16.mxu1 %v2434_v3 }
 0x231   :  { %658 = vmatprep.mubr.f32.mxu0 %v2435_v4  ;;  %1760 = vmatprep.mubr.msk.f32.mxu1 %vm2436_vm0, %v2435_v4 }
 0x233   :  { %2078 = vmatpush1.bf16.msra.mxu0 %v2504_v15  ;;  %2108 = vmatpush3.bf16.msra.mxu1 %v2569_v37 }
 0x234   :  { %2080 = vmatprep.subr.bf16.mxu0 %v2507_v16  ;;  %2109 = vmatprep.subr.bf16.mxu1 %v2434_v3 }
 0x237   :  { %2082 = vmatpush1.bf16.msra.mxu0 %v2522_v21  ;;  %2111 = vmatpush3.bf16.msra.mxu1 %v2597_v46 }
 0x238   :  { %2084 = vmatprep.subr.bf16.mxu0 %v2525_v22  ;;  %2112 = vmatprep.subr.bf16.mxu1 %v2434_v3 }
 0x23b   :  { %2086 = vmatpush1.bf16.msra.mxu0 %v2554_v32  ;;  %2114 = vmatpush3.bf16.msra.mxu1 %v2625_v55 }
 0x23c   :  { %2088 = vmatprep.subr.bf16.mxu0 %v2557_v33  ;;  %2115 = vmatprep.subr.bf16.mxu1 %v2434_v3 }
 0x23f   :  { %2090 = vmatpush1.bf16.msra.mxu0 %v2582_v41  ;;  %2117 = vmatpush3.bf16.msra.mxu1 %v2650_v63 }
 0x240   :  { %2092 = vmatprep.subr.bf16.mxu0 %v2585_v42  ;;  %2118 = vmatprep.subr.bf16.mxu1 %v2434_v3 }
 0x243   :  { %2094 = vmatpush1.bf16.msra.mxu0 %v2610_v50  ;;  %2120 = vmatpush3.bf16.msra.mxu1 %v2664_v6 }
 0x244   :  { %2096 = vmatprep.subr.bf16.mxu0 %v2613_v51  ;;  %2121 = vmatprep.subr.bf16.mxu1 %v2434_v3 }
 0x247   :  { %2098 = vmatpush1.bf16.msra.mxu0 %v2638_v59  ;;  %2123 = vmatpush3.bf16.msra.mxu1 %v2675_v11 }
 0x248   :  { %2100 = vmatprep.subr.bf16.mxu0 %v2641_v60  ;;  %2124 = vmatprep.subr.bf16.mxu1 %v2434_v3 }
 0x24b   :  { %2102 = vmatpush1.bf16.msra.mxu0 %v2660_v2  ;;  %2126 = vmatpush3.bf16.msra.mxu1 %v2689_v14 }
 0x24c   :  { %2128 = vmatprep.subr.bf16.mxu0 %v2473_v5  ;;  %2159 = vmatprep.subr.bf16.mxu1 %v2434_v3 }
 0x301   :  { %v492_v58 = vpop.f32.mrb[4].mxu0  ;;  %v563_v61 = vpop.f32.mrb[4].mxu1 }
 0x302   :  { %v493_v62 = vadd.f32 %v492_v58, %v2731_v24  ;;  %v494_v0 = vpop.f32.mrb[5].mxu0  ;;  %v1727_v1 = vpop.f32.mrb[5].mxu1  ;;  %v564_v27 = vadd.f32 %v563_v61, %v2743_v48 }
 0x303   :  { %v495_v7 = vadd.f32 %v494_v0, %v2733_v25 }
 0x304   :  { %v567_v8 = vadd.f32 %v1451_v57, %v493_v62  ;;  %v1458_v57 = vld [vmem:[%s3106_s0 + $0x50] sm:$0xff] }
 0x305   :  { %v574_v17 = vadd.f32 %v1452_v12, %v495_v7 }
 0x306   :  { %v1454_v13 = vmul.f32 -1.442695, %v567_v8 }
 0x307   :  { %v1455_v18 = vmul.f32 -1.442695, %v574_v17  ;;  %v1459_v17 = vld [vmem:[%s3106_s0 + $0x58] sm:$0xff] }
 0x308   :  { %2374 = vpow2.f32 %v1454_v13 }
 0x309   :  { %2376 = vpow2.f32 %v1455_v18 }
 0x312   :  { %v2375_v19 = vpop.eup %2374 }
 0x313   :  { %v571_v20 = vadd.f32 1.0, %v2375_v19  ;;  %v2377_v23 = vpop.eup %2376 }
 0x314   :  { %v578_v26 = vadd.f32 1.0, %v2377_v23 }
 0x315   :  { %2378 = vrcp.f32 %v571_v20 }
 0x316   :  { %2380 = vrcp.f32 %v578_v26 }
 0x31f   :  { %v2379_v28 = vpop.eup %2378 }
 0x320   :  { %v581_v31 = vmul.f32 %v2379_v28, %v564_v27  ;;  %v2381_v35 = vpop.eup %2380 }
 0x321   :  { %v584_v36 = vsub.f32 1.0, %v2381_v35  ;;  %v586_v40 = vmul.f32 %v2381_v35, %v2805_v56 }
 0x322   :  { %v582_v34 = vadd.f32 %v1453_v30, %v581_v31  ;;  %v1463_v31 = vld [vmem:[%s3106_s0 + $0x60] sm:$0xff] }
 0x324   :  { %2382 = vtanh.f32 %v582_v34 }
 0x32e   :  { %v2383_v38 = vpop.eup %2382 }
 0x32f   :  { %v585_v39 = vmul.f32 %v2383_v38, %v584_v36 }
 0x331   :  { %v2861_v43 = vadd.f32 %v586_v40, %v585_v39 }
 0x333   :  { %1456 = vst [vmem:[%s3107_s3 + $0x10] sm:$0xff] %v2861_v43  ;;  %659 = vmatmul.mubr.f32.vlgmr.msra.gmra.mrb[6].mxu0 %v2861_v43  ;;  %1761 = vmatmul.mubr.f32.vlgmr.msra.gmra.mrb[6].mxu1 %v2861_v43 }
 0x334   :  { %2130 = vmatpush1.bf16.msra.mxu0 %v2486_v9  ;;  %2161 = vmatpush3.bf16.msra.mxu1 %v2545_v29 }
 0x335   :  { %2132 = vmatprep.subr.bf16.mxu0 %v2488_v10  ;;  %2162 = vmatprep.subr.bf16.mxu1 %v2434_v3 }
 0x336   :  { %826 = vmatprep.mubr.f32.mxu0 %v2435_v4  ;;  %1795 = vmatprep.mubr.msk.f32.mxu1 %vm2436_vm0, %v2435_v4 }
 0x338   :  { %2134 = vmatpush1.bf16.msra.mxu0 %v2504_v15  ;;  %2164 = vmatpush3.bf16.msra.mxu1 %v2569_v37 }
 0x339   :  { %2136 = vmatprep.subr.bf16.mxu0 %v2507_v16  ;;  %2165 = vmatprep.subr.bf16.mxu1 %v2434_v3 }
 0x33c   :  { %2138 = vmatpush1.bf16.msra.mxu0 %v2522_v21  ;;  %2167 = vmatpush3.bf16.msra.mxu1 %v2597_v46 }
 0x33d   :  { %2140 = vmatprep.subr.bf16.mxu0 %v2525_v22  ;;  %2168 = vmatprep.subr.bf16.mxu1 %v2434_v3 }
 0x340   :  { %2142 = vmatpush1.bf16.msra.mxu0 %v2554_v32  ;;  %2170 = vmatpush3.bf16.msra.mxu1 %v2625_v55 }
 0x341   :  { %2144 = vmatprep.subr.bf16.mxu0 %v2557_v33  ;;  %2171 = vmatprep.subr.bf16.mxu1 %v2434_v3 }
 0x344   :  { %2146 = vmatpush1.bf16.msra.mxu0 %v2582_v41  ;;  %2173 = vmatpush3.bf16.msra.mxu1 %v2650_v63 }
 0x345   :  { %2148 = vmatprep.subr.bf16.mxu0 %v2585_v42  ;;  %2174 = vmatprep.subr.bf16.mxu1 %v2434_v3 }
 0x348   :  { %2150 = vmatpush1.bf16.msra.mxu0 %v2610_v50  ;;  %2176 = vmatpush3.bf16.msra.mxu1 %v2664_v6 }
 0x349   :  { %2152 = vmatprep.subr.bf16.mxu0 %v2613_v51  ;;  %2177 = vmatprep.subr.bf16.mxu1 %v2434_v3 }
 0x34c   :  { %2154 = vmatpush1.bf16.msra.mxu0 %v2638_v59  ;;  %2179 = vmatpush3.bf16.msra.mxu1 %v2675_v11 }
 0x34d   :  { %2156 = vmatprep.subr.bf16.mxu0 %v2641_v60  ;;  %2180 = vmatprep.subr.bf16.mxu1 %v2434_v3 }
 0x350   :  { %2158 = vmatpush1.bf16.msra.mxu0 %v2660_v2  ;;  %2182 = vmatpush3.bf16.msra.mxu1 %v2689_v14 }
 0x351   :  { %2184 = vmatprep.subr.bf16.mxu0 %v2473_v5  ;;  %2215 = vmatprep.subr.bf16.mxu1 %v2434_v3 }
 0x406   :  { %v660_v45 = vpop.f32.mrb[6].mxu0  ;;  %v731_v47 = vpop.f32.mrb[6].mxu1 }
 0x407   :  { %v661_v49 = vadd.f32 %v660_v45, %v2731_v24  ;;  %v662_v52 = vpop.f32.mrb[7].mxu0  ;;  %v1762_v53 = vpop.f32.mrb[7].mxu1  ;;  %v732_v12 = vadd.f32 %v731_v47, %v2743_v48 }
 0x408   :  { %v663_v54 = vadd.f32 %v662_v52, %v2733_v25 }
 0x409   :  { %v735_v56 = vadd.f32 %v1457_v44, %v661_v49  ;;  %v1464_v44 = vld [vmem:[%s3106_s0 + $0x68] sm:$0xff] }
 0x40a   :  { %v742_v61 = vadd.f32 %v1458_v57, %v663_v54 }
 0x40b   :  { %v1460_v58 = vmul.f32 -1.442695, %v735_v56 }
 0x40c   :  { %v1461_v62 = vmul.f32 -1.442695, %v742_v61  ;;  %v1465_v61 = vld [vmem:[%s3106_s0 + $0x70] sm:$0xff] }
 0x40d   :  { %2384 = vpow2.f32 %v1460_v58 }
 0x40e   :  { %2386 = vpow2.f32 %v1461_v62 }
 0x417   :  { %v2385_v0 = vpop.eup %2384 }
 0x418   :  { %v739_v1 = vadd.f32 1.0, %v2385_v0  ;;  %v2387_v7 = vpop.eup %2386 }
 0x419   :  { %v746_v8 = vadd.f32 1.0, %v2387_v7 }
 0x41a   :  { %2388 = vrcp.f32 %v739_v1 }
 0x41b   :  { %2390 = vrcp.f32 %v746_v8 }
 0x424   :  { %v2389_v13 = vpop.eup %2388 }
 0x425   :  { %v749_v18 = vmul.f32 %v2389_v13, %v732_v12  ;;  %v2391_v20 = vpop.eup %2390 }
 0x426   :  { %v752_v23 = vsub.f32 1.0, %v2391_v20  ;;  %v754_v28 = vmul.f32 %v2391_v20, %v2861_v43 }
 0x427   :  { %v750_v19 = vadd.f32 %v1459_v17, %v749_v18  ;;  %v1469_v18 = vld [vmem:[%s3106_s0 + $0x78] sm:$0xff] }
 0x429   :  { %2392 = vtanh.f32 %v750_v19 }
 0x433   :  { %v2393_v26 = vpop.eup %2392 }
 0x434   :  { %v753_v27 = vmul.f32 %v2393_v26, %v752_v23 }
 0x436   :  { %v2917_v30 = vadd.f32 %v754_v28, %v753_v27 }
 0x438   :  { %1462 = vst [vmem:[%s3107_s3 + $0x18] sm:$0xff] %v2917_v30  ;;  %827 = vmatmul.mubr.f32.vlgmr.msra.gmra.mrb[8].mxu0 %v2917_v30  ;;  %1796 = vmatmul.mubr.f32.vlgmr.msra.gmra.mrb[8].mxu1 %v2917_v30 }
 0x439   :  { %2186 = vmatpush1.bf16.msra.mxu0 %v2486_v9  ;;  %2217 = vmatpush3.bf16.msra.mxu1 %v2545_v29 }
 0x43a   :  { %2188 = vmatprep.subr.bf16.mxu0 %v2488_v10  ;;  %2218 = vmatprep.subr.bf16.mxu1 %v2434_v3 }
 0x43b   :  { %994 = vmatprep.mubr.f32.mxu0 %v2435_v4  ;;  %1830 = vmatprep.mubr.msk.f32.mxu1 %vm2436_vm0, %v2435_v4 }
 0x43d   :  { %2190 = vmatpush1.bf16.msra.mxu0 %v2504_v15  ;;  %2220 = vmatpush3.bf16.msra.mxu1 %v2569_v37 }
 0x43e   :  { %2192 = vmatprep.subr.bf16.mxu0 %v2507_v16  ;;  %2221 = vmatprep.subr.bf16.mxu1 %v2434_v3 }
 0x441   :  { %2194 = vmatpush1.bf16.msra.mxu0 %v2522_v21  ;;  %2223 = vmatpush3.bf16.msra.mxu1 %v2597_v46 }
 0x442   :  { %2196 = vmatprep.subr.bf16.mxu0 %v2525_v22  ;;  %2224 = vmatprep.subr.bf16.mxu1 %v2434_v3 }
 0x445   :  { %2198 = vmatpush1.bf16.msra.mxu0 %v2554_v32  ;;  %2226 = vmatpush3.bf16.msra.mxu1 %v2625_v55 }
 0x446   :  { %2200 = vmatprep.subr.bf16.mxu0 %v2557_v33  ;;  %2227 = vmatprep.subr.bf16.mxu1 %v2434_v3 }
 0x449   :  { %2202 = vmatpush1.bf16.msra.mxu0 %v2582_v41  ;;  %2229 = vmatpush3.bf16.msra.mxu1 %v2650_v63 }
 0x44a   :  { %2204 = vmatprep.subr.bf16.mxu0 %v2585_v42  ;;  %2230 = vmatprep.subr.bf16.mxu1 %v2434_v3 }
 0x44d   :  { %2206 = vmatpush1.bf16.msra.mxu0 %v2610_v50  ;;  %2232 = vmatpush3.bf16.msra.mxu1 %v2664_v6 }
 0x44e   :  { %2208 = vmatprep.subr.bf16.mxu0 %v2613_v51  ;;  %2233 = vmatprep.subr.bf16.mxu1 %v2434_v3 }
 0x451   :  { %2210 = vmatpush1.bf16.msra.mxu0 %v2638_v59  ;;  %2235 = vmatpush3.bf16.msra.mxu1 %v2675_v11 }
 0x452   :  { %2212 = vmatprep.subr.bf16.mxu0 %v2641_v60  ;;  %2236 = vmatprep.subr.bf16.mxu1 %v2434_v3 }
 0x455   :  { %2214 = vmatpush1.bf16.msra.mxu0 %v2660_v2  ;;  %2238 = vmatpush3.bf16.msra.mxu1 %v2689_v14 }
 0x456   :  { %2240 = vmatprep.subr.bf16.mxu0 %v2473_v5  ;;  %2271 = vmatprep.subr.bf16.mxu1 %v2434_v3 }
 0x50b   :  { %v828_v34 = vpop.f32.mrb[8].mxu0  ;;  %v899_v35 = vpop.f32.mrb[8].mxu1 }
 0x50c   :  { %v829_v36 = vadd.f32 %v828_v34, %v2731_v24  ;;  %v830_v38 = vpop.f32.mrb[9].mxu0  ;;  %v1797_v39 = vpop.f32.mrb[9].mxu1  ;;  %v900_v57 = vadd.f32 %v899_v35, %v2743_v48 }
 0x50d   :  { %v831_v40 = vadd.f32 %v830_v38, %v2733_v25 }
 0x50e   :  { %v903_v43 = vadd.f32 %v1463_v31, %v829_v36  ;;  %v1470_v31 = vld [vmem:[%s3106_s0 + $0x80] sm:$0xff] }
 0x50f   :  { %v910_v47 = vadd.f32 %v1464_v44, %v831_v40 }
 0x510   :  { %v1466_v45 = vmul.f32 -1.442695, %v903_v43 }
 0x511   :  { %v1467_v49 = vmul.f32 -1.442695, %v910_v47 }
 0x512   :  { %2394 = vpow2.f32 %v1466_v45  ;;  %v1471_v45 = vld [vmem:[%s3106_s0 + $0x88] sm:$0xff] }
 0x513   :  { %2396 = vpow2.f32 %v1467_v49 }
 0x51c   :  { %v2395_v52 = vpop.eup %2394 }
 0x51d   :  { %v907_v53 = vadd.f32 1.0, %v2395_v52  ;;  %v2397_v54 = vpop.eup %2396 }
 0x51e   :  { %v914_v56 = vadd.f32 1.0, %v2397_v54 }
 0x51f   :  { %2398 = vrcp.f32 %v907_v53 }
 0x520   :  { %2400 = vrcp.f32 %v914_v56 }
 0x529   :  { %v2399_v58 = vpop.eup %2398 }
 0x52a   :  { %v917_v62 = vmul.f32 %v2399_v58, %v900_v57  ;;  %v2401_v1 = vpop.eup %2400 }
 0x52b   :  { %v920_v7 = vsub.f32 1.0, %v2401_v1  ;;  %v922_v13 = vmul.f32 %v2401_v1, %v2917_v30 }
 0x52c   :  { %v918_v0 = vadd.f32 %v1465_v61, %v917_v62 }
 0x52e   :  { %2402 = vtanh.f32 %v918_v0  ;;  %v1481_v0 = vld [vmem:[%s3106_s0 + $0xa8] sm:$0xff] }
 0x538   :  { %v2403_v8 = vpop.eup %2402 }
 0x539   :  { %v921_v12 = vmul.f32 %v2403_v8, %v920_v7 }
 0x53b   :  { %v2973_v17 = vadd.f32 %v922_v13, %v921_v12 }
 0x53d   :  { %1468 = vst [vmem:[%s3107_s3 + $0x20] sm:$0xff] %v2973_v17  ;;  %995 = vmatmul.mubr.f32.vlgmr.msra.gmra.mrb[10].mxu0 %v2973_v17  ;;  %1831 = vmatmul.mubr.f32.vlgmr.msra.gmra.mrb[10].mxu1 %v2973_v17 }
 0x53e   :  { %2242 = vmatpush1.bf16.msra.mxu0 %v2486_v9  ;;  %2273 = vmatpush3.bf16.msra.mxu1 %v2545_v29 }
 0x53f   :  { %2244 = vmatprep.subr.bf16.mxu0 %v2488_v10  ;;  %2274 = vmatprep.subr.bf16.mxu1 %v2434_v3 }
 0x540   :  { %1162 = vmatprep.mubr.f32.mxu0 %v2435_v4  ;;  %1865 = vmatprep.mubr.msk.f32.mxu1 %vm2436_vm0, %v2435_v4 }
 0x542   :  { %2246 = vmatpush1.bf16.msra.mxu0 %v2504_v15  ;;  %2276 = vmatpush3.bf16.msra.mxu1 %v2569_v37 }
 0x543   :  { %2248 = vmatprep.subr.bf16.mxu0 %v2507_v16  ;;  %2277 = vmatprep.subr.bf16.mxu1 %v2434_v3 }
 0x546   :  { %2250 = vmatpush1.bf16.msra.mxu0 %v2522_v21  ;;  %2279 = vmatpush3.bf16.msra.mxu1 %v2597_v46 }
 0x547   :  { %2252 = vmatprep.subr.bf16.mxu0 %v2525_v22  ;;  %2280 = vmatprep.subr.bf16.mxu1 %v2434_v3 }
 0x54a   :  { %2254 = vmatpush1.bf16.msra.mxu0 %v2554_v32  ;;  %2282 = vmatpush3.bf16.msra.mxu1 %v2625_v55 }
 0x54b   :  { %2256 = vmatprep.subr.bf16.mxu0 %v2557_v33  ;;  %2283 = vmatprep.subr.bf16.mxu1 %v2434_v3 }
 0x54e   :  { %2258 = vmatpush1.bf16.msra.mxu0 %v2582_v41  ;;  %2285 = vmatpush3.bf16.msra.mxu1 %v2650_v63 }
 0x54f   :  { %2260 = vmatprep.subr.bf16.mxu0 %v2585_v42  ;;  %2286 = vmatprep.subr.bf16.mxu1 %v2434_v3 }
 0x552   :  { %2262 = vmatpush1.bf16.msra.mxu0 %v2610_v50  ;;  %2288 = vmatpush3.bf16.msra.mxu1 %v2664_v6 }
 0x553   :  { %2264 = vmatprep.subr.bf16.mxu0 %v2613_v51  ;;  %2289 = vmatprep.subr.bf16.mxu1 %v2434_v3 }
 0x556   :  { %2266 = vmatpush1.bf16.msra.mxu0 %v2638_v59  ;;  %2291 = vmatpush3.bf16.msra.mxu1 %v2675_v11 }
 0x557   :  { %2268 = vmatprep.subr.bf16.mxu0 %v2641_v60  ;;  %2292 = vmatprep.subr.bf16.mxu1 %v2434_v3 }
 0x55a   :  { %2270 = vmatpush1.bf16.msra.mxu0 %v2660_v2  ;;  %2294 = vmatpush3.bf16.msra.mxu1 %v2689_v14 }
 0x55b   :  { %2296 = vmatprep.subr.bf16.mxu0 %v2473_v5  ;;  %2327 = vmatprep.subr.bf16.mxu1 %v2434_v3 }
 0x610   :  { %v996_v19 = vpop.f32.mrb[10].mxu0  ;;  %v1067_v20 = vpop.f32.mrb[10].mxu1 }
 0x611   :  { %v997_v23 = vadd.f32 %v996_v19, %v2731_v24  ;;  %v998_v26 = vpop.f32.mrb[11].mxu0  ;;  %v1832_v27 = vpop.f32.mrb[11].mxu1  ;;  %v1068_v43 = vadd.f32 %v1067_v20, %v2743_v48  ;;  %v1482_v19 = vld [vmem:[%s3106_s0 + $0xb0] sm:$0xff] }
 0x612   :  { %v999_v28 = vadd.f32 %v998_v26, %v2733_v25 }
 0x613   :  { %v1071_v30 = vadd.f32 %v1469_v18, %v997_v23 }
 0x614   :  { %v1078_v34 = vadd.f32 %v1470_v31, %v999_v28 }
 0x615   :  { %v1472_v5 = vmul.f32 -1.442695, %v1071_v30 }
 0x616   :  { %v1473_v35 = vmul.f32 -1.442695, %v1078_v34 }
 0x617   :  { %2404 = vpow2.f32 %v1472_v5 }
 0x618   :  { %2406 = vpow2.f32 %v1473_v35 }
 0x621   :  { %v2405_v36 = vpop.eup %2404 }
 0x622   :  { %v1075_v38 = vadd.f32 1.0, %v2405_v36  ;;  %v2407_v39 = vpop.eup %2406 }
 0x623   :  { %v1082_v40 = vadd.f32 1.0, %v2407_v39 }
 0x624   :  { %2408 = vrcp.f32 %v1075_v38 }
 0x625   :  { %2410 = vrcp.f32 %v1082_v40 }
 0x62e   :  { %v2409_v44 = vpop.eup %2408 }
 0x62f   :  { %v1085_v47 = vmul.f32 %v2409_v44, %v1068_v43  ;;  %v2411_v52 = vpop.eup %2410 }
 0x630   :  { %v1088_v53 = vsub.f32 1.0, %v2411_v52  ;;  %v1090_v57 = vmul.f32 %v2411_v52, %v2973_v17 }
 0x631   :  { %v1086_v49 = vadd.f32 %v1471_v45, %v1085_v47 }
 0x633   :  { %2412 = vtanh.f32 %v1086_v49 }
 0x63d   :  { %v2413_v54 = vpop.eup %2412 }
 0x63e   :  { %v1089_v56 = vmul.f32 %v2413_v54, %v1088_v53 }
 0x640   :  { %v3029_v58 = vadd.f32 %v1090_v57, %v1089_v56 }
 0x642   :  { %1474 = vst [vmem:[%s3107_s3 + $0x28] sm:$0xff] %v3029_v58  ;;  %1163 = vmatmul.mubr.f32.vlgmr.msra.gmra.mrb[12].mxu0 %v3029_v58  ;;  %1866 = vmatmul.mubr.f32.vlgmr.msra.gmra.mrb[12].mxu1 %v3029_v58 }
 0x643   :  { %2298 = vmatpush1.bf16.msra.mxu0 %v2486_v9  ;;  %2329 = vmatpush3.bf16.msra.mxu1 %v2545_v29 }
 0x644   :  { %2300 = vmatprep.subr.bf16.mxu0 %v2488_v10  ;;  %2330 = vmatprep.subr.bf16.mxu1 %v2434_v3 }
 0x645   :  { %1330 = vmatprep.mubr.f32.mxu0 %v2435_v4  ;;  %1900 = vmatprep.mubr.msk.f32.mxu1 %vm2436_vm0, %v2435_v4  ;;  %v1475_v4 = vld [vmem:[%s3106_s0 + $0x90] sm:$0xff] }
 0x647   :  { %2302 = vmatpush1.bf16.msra.mxu0 %v2504_v15  ;;  %2332 = vmatpush3.bf16.msra.mxu1 %v2569_v37 }
 0x648   :  { %2304 = vmatprep.subr.bf16.mxu0 %v2507_v16  ;;  %2333 = vmatprep.subr.bf16.mxu1 %v2434_v3 }
 0x64b   :  { %2306 = vmatpush1.bf16.msra.mxu0 %v2522_v21  ;;  %2335 = vmatpush3.bf16.msra.mxu1 %v2597_v46 }
 0x64c   :  { %2308 = vmatprep.subr.bf16.mxu0 %v2525_v22  ;;  %2336 = vmatprep.subr.bf16.mxu1 %v2434_v3 }
 0x64f   :  { %2310 = vmatpush1.bf16.msra.mxu0 %v2554_v32  ;;  %2338 = vmatpush3.bf16.msra.mxu1 %v2625_v55 }
 0x650   :  { %2312 = vmatprep.subr.bf16.mxu0 %v2557_v33  ;;  %2339 = vmatprep.subr.bf16.mxu1 %v2434_v3 }
 0x653   :  { %2314 = vmatpush1.bf16.msra.mxu0 %v2582_v41  ;;  %2341 = vmatpush3.bf16.msra.mxu1 %v2650_v63 }
 0x654   :  { %2316 = vmatprep.subr.bf16.mxu0 %v2585_v42  ;;  %2342 = vmatprep.subr.bf16.mxu1 %v2434_v3 }
 0x657   :  { %2318 = vmatpush1.bf16.msra.mxu0 %v2610_v50  ;;  %2344 = vmatpush3.bf16.msra.mxu1 %v2664_v6 }
 0x658   :  { %2320 = vmatprep.subr.bf16.mxu0 %v2613_v51  ;;  %2345 = vmatprep.subr.bf16.mxu1 %v2434_v3 }
 0x65b   :  { %2322 = vmatpush1.bf16.msra.mxu0 %v2638_v59  ;;  %2347 = vmatpush3.bf16.msra.mxu1 %v2675_v11  ;;  %v1477_v59 = vld [vmem:[%s3106_s0 + $0xa0] sm:$0xff] }
 0x65c   :  { %2324 = vmatprep.subr.bf16.mxu0 %v2641_v60  ;;  %2348 = vmatprep.subr.bf16.mxu1 %v2434_v3  ;;  %v1476_v3 = vld [vmem:[%s3106_s0 + $0x98] sm:$0xff] }
 0x65f   :  { %2326 = vmatpush1.bf16.msra.mxu0 %v2660_v2  ;;  %2350 = vmatpush3.bf16.msra.mxu1 %v2689_v14 }
 0x715   :  { %v1164_v9 = vpop.f32.mrb[12].mxu0  ;;  %v1235_v10 = vpop.f32.mrb[12].mxu1 }
 0x716   :  { %v1165_v15 = vadd.f32 %v1164_v9, %v2731_v24  ;;  %v1166_v16 = vpop.f32.mrb[13].mxu0  ;;  %v1867_v21 = vpop.f32.mrb[13].mxu1  ;;  %v1236_v51 = vadd.f32 %v1235_v10, %v2743_v48 }
 0x717   :  { %v1167_v22 = vadd.f32 %v1166_v16, %v2733_v25 }
 0x718   :  { %v1239_v29 = vadd.f32 %v1475_v4, %v1165_v15 }
 0x719   :  { %v1246_v33 = vadd.f32 %v1476_v3, %v1167_v22 }
 0x71a   :  { %v1478_v32 = vmul.f32 -1.442695, %v1239_v29 }
 0x71b   :  { %v1479_v37 = vmul.f32 -1.442695, %v1246_v33 }
 0x71c   :  { %2414 = vpow2.f32 %v1478_v32 }
 0x71d   :  { %2416 = vpow2.f32 %v1479_v37 }
 0x726   :  { %v2415_v41 = vpop.eup %2414 }
 0x727   :  { %v1243_v42 = vadd.f32 1.0, %v2415_v41  ;;  %v2417_v46 = vpop.eup %2416 }
 0x728   :  { %v1250_v50 = vadd.f32 1.0, %v2417_v46 }
 0x729   :  { %2418 = vrcp.f32 %v1243_v42 }
 0x72a   :  { %2420 = vrcp.f32 %v1250_v50 }
 0x733   :  { %v2419_v55 = vpop.eup %2418 }
 0x734   :  { %v1253_v60 = vmul.f32 %v2419_v55, %v1236_v51  ;;  %v2421_v2 = vpop.eup %2420 }
 0x735   :  { %v1256_v6 = vsub.f32 1.0, %v2421_v2  ;;  %v1258_v61 = vmul.f32 %v2421_v2, %v3029_v58 }
 0x736   :  { %v1254_v63 = vadd.f32 %v1477_v59, %v1253_v60 }
 0x738   :  { %2422 = vtanh.f32 %v1254_v63 }
 0x742   :  { %v2423_v11 = vpop.eup %2422 }
 0x743   :  { %v1257_v14 = vmul.f32 %v2423_v11, %v1256_v6 }
 0x745   :  { %v1259_v62 = vadd.f32 %v1258_v61, %v1257_v14 }
 0x747   :  { %1480 = vst [vmem:[%s3107_s3 + $0x30] sm:$0xff] %v1259_v62  ;;  %1331 = vmatmul.mubr.f32.vlgmr.msra.gmra.mrb[14].mxu0 %v1259_v62  ;;  %1901 = vmatmul.mubr.f32.vlgmr.msra.gmra.mrb[14].mxu1 %v1259_v62 }
 0x81a   :  { %v1332_v1 = vpop.f32.mrb[14].mxu0  ;;  %v1403_v7 = vpop.f32.mrb[14].mxu1 }
 0x81b   :  { %v1333_v8 = vadd.f32 %v1332_v1, %v2731_v24  ;;  %v1334_v12 = vpop.f32.mrb[15].mxu0  ;;  %v1902_v13 = vpop.f32.mrb[15].mxu1  ;;  %v1404_v24 = vadd.f32 %v1403_v7, %v2743_v48 }
 0x81c   :  { %v1335_v17 = vadd.f32 %v1334_v12, %v2733_v25  ;;  %v1483_v25 = vld [vmem:[%s3106_s0 + $0xb8] sm:$0xff] }
 0x81d   :  { %v1407_v18 = vadd.f32 %v1481_v0, %v1333_v8 }
 0x81e   :  { %v1414_v23 = vadd.f32 %v1482_v19, %v1335_v17 }
 0x81f   :  { %v1484_v20 = vmul.f32 -1.442695, %v1407_v18 }
 0x820   :  { %v1485_v26 = vmul.f32 -1.442695, %v1414_v23 }
 0x821   :  { %2424 = vpow2.f32 %v1484_v20 }
 0x822   :  { %2426 = vpow2.f32 %v1485_v26 }
 0x82b   :  { %v2425_v27 = vpop.eup %2424 }
 0x82c   :  { %v1411_v28 = vadd.f32 1.0, %v2425_v27  ;;  %v2427_v30 = vpop.eup %2426 }
 0x82d   :  { %v1418_v31 = vadd.f32 1.0, %v2427_v30 }
 0x82e   :  { %2428 = vrcp.f32 %v1411_v28 }
 0x82f   :  { %2430 = vrcp.f32 %v1418_v31 }
 0x838   :  { %v2429_v5 = vpop.eup %2428 }
 0x839   :  { %v1421_v34 = vmul.f32 %v2429_v5, %v1404_v24  ;;  %v2431_v36 = vpop.eup %2430 }
 0x83a   :  { %v1424_v38 = vsub.f32 1.0, %v2431_v36  ;;  %v1426_v43 = vmul.f32 %v2431_v36, %v1259_v62 }
 0x83b   :  { %v1422_v35 = vadd.f32 %v1483_v25, %v1421_v34 }
 0x83d   :  { %2432 = vtanh.f32 %v1422_v35 }
 0x847   :  { %v2433_v39 = vpop.eup %2432 }
 0x848   :  { %v1425_v40 = vmul.f32 %v2433_v39, %v1424_v38 }
 0x84a   :  { %v1427_v44 = vadd.f32 %v1426_v43, %v1425_v40 }
 0x84c   :  { %1486 = vst [vmem:[%s3107_s3 + $0x38] sm:$0xff] %v1427_v44  ;;  %1434 = vst [vmem:[%s3108_s4] sm:$0xff] %v1427_v44 }

</bundles_post_ra>
